<compile_context>
chip_gen: v7x
topology: tpu7x:2x2x1
jax: 0.10.0
libtpu: 0.0.40
codegen_flags: <defaults>
</compile_context>

<pallas_src>
import numpy as np
import jax
import jax.numpy as jnp
from jax.experimental import pallas as pl
from jax.experimental.pallas import tpu as pltpu


def decoder_kernel(xe_ref, yprev_ref, attn_pack_ref, gate_pack_ref, out_ref):
    f32 = jnp.float32
    B, Tm1, Eh = xe_ref.shape
    Dh = gate_pack_ref.shape[1] // 4          # 4*Dh gate lanes
    DE = Dh + Eh                               # width of [d | context]

    xe = xe_ref[...]                           # (B, T-1, Eh)
    yprev = yprev_ref[...]                     # (B, T-1)

    # ---------------- unpack consolidated weight slabs (static slices, hoisted) ----------
    w1xT = attn_pack_ref[0:Eh, :]                               # (Eh, Eh)   X part of attn Linear1
    w1dcT = attn_pack_ref[Eh:Eh + 2 * Dh, :]                    # (2Dh, Eh)  [d ; c] part
    b1_row = attn_pack_ref[Eh + 2 * Dh:Eh + 2 * Dh + 1, :]      # (1, Eh)
    w2_b = attn_pack_ref[Eh + 2 * Dh + 1:Eh + 2 * Dh + 2, :].reshape(1, 1, Eh)

    gateW = gate_pack_ref[0:DE, :]                              # (Dh+Eh, 4Dh) [Whh^T ; outer(fc_ctx, w_ih)]
    wih_row = gate_pack_ref[DE:DE + 1, :]                       # (1, 4Dh)  fcw_y * w_ih
    lb_row = gate_pack_ref[DE + 1:DE + 2, :]                    # (1, 4Dh)  fcb*w_ih + b_ih + b_hh
    g_scale = gate_pack_ref[DE + 2:DE + 3, :]                   # (1, 4Dh)  0.5 (sigmoid lanes) / 1.0 (g lanes)
    g_off = gate_pack_ref[DE + 3:DE + 4, :]                     # (1, 4Dh)  0.5 / 0.0
    ffw_row = gate_pack_ref[DE + 4:DE + 5, 0:DE]                # (1, Dh+Eh) fc_final weight for [d | context]
    ffb = gate_pack_ref[DE + 5:DE + 6, 0:1]                     # (1, 1)     fc_final bias

    # -------- hoisted, loop-invariant: attn Linear1 applied to X (per-batch 2D MXU matmuls)
    proj_xb = jnp.stack(
        [jnp.dot(xe[b], w1xT, preferred_element_type=f32) + b1_row for b in range(B)],
        axis=0)                                                 # (B, T-1, Eh)

    d = jnp.zeros((B, Dh), f32)
    c = jnp.zeros((B, Dh), f32)
    context = jnp.zeros((B, Eh), f32)

    # ---------------- T-1 recurrence, statically unrolled ---------------------------------
    for t in range(Tm1):
        # attention over the T-1 encoder steps (Linear2 bias dropped: softmax-invariant)
        dc = jnp.concatenate([d, c], axis=-1)                          # (B, 2Dh)
        proj_dc = jnp.dot(dc, w1dcT, preferred_element_type=f32)       # (B, Eh)
        h = jnp.tanh(proj_xb + proj_dc[:, None, :])                    # (B, T-1, Eh)
        s = jnp.sum(h * w2_b, axis=-1, keepdims=True)                  # (B, T-1, 1)
        s = s - jnp.max(s, axis=1, keepdims=True)
        p = jnp.exp(s)                                                 # (B, T-1, 1)
        ctx_un = jnp.sum(p * xe, axis=1)                               # (B, Eh)   sum_t p_t * X_t  (VPU)
        den = jnp.sum(p, axis=1)                                       # (B, 1)
        context = ctx_un * pl.reciprocal(den, approx=True)             # (B, Eh)

        # one fused LSTM step: recurrent + context + y_prev gate inputs in a single matmul
        d_ctx = jnp.concatenate([d, context], axis=-1)                 # (B, Dh+Eh)
        gates = (jnp.dot(d_ctx, gateW, preferred_element_type=f32)
                 + yprev[:, t:t + 1] * wih_row + lb_row)               # (B, 4Dh)  i|f|g|o
        # single EUP pass: tanh(x) on g lanes, 0.5*tanh(0.5x)+0.5 (= sigmoid) on i/f/o lanes
        act = jnp.tanh(gates * g_scale) * g_scale + g_off
        i_g = act[:, 0:Dh]
        f_g = act[:, Dh:2 * Dh]
        g_g = act[:, 2 * Dh:3 * Dh]
        o_g = act[:, 3 * Dh:4 * Dh]
        c = f_g * c + i_g * g_g
        d = o_g * jnp.tanh(c)

    # ---------------- fc_final on cat(d_n[0], context) ------------------------------------
    d_ctx = jnp.concatenate([d, context], axis=-1)                     # (B, Dh+Eh)
    out_ref[...] = jnp.sum(d_ctx * ffw_row, axis=-1, keepdims=True) + ffb


def make_raw_params(key, Dh, Eh):
    """Deterministic synthetic parameters in native PyTorch (out, in) orientation."""
    keys = jax.random.split(key, 12)

    def init(k, shape, scale):
        return jax.random.normal(k, shape, jnp.float32) * scale

    attn_in = 2 * Dh + Eh
    W1 = init(keys[0], (Eh, attn_in), 1.0 / np.sqrt(attn_in))    # attn Linear1
    b1 = init(keys[1], (Eh,), 0.1)
    W2 = init(keys[2], (1, Eh), 1.0 / np.sqrt(Eh))               # attn Linear2
    b2 = init(keys[3], (1,), 0.1)
    Wih = init(keys[4], (4 * Dh, 1), 1.0 / np.sqrt(Dh))          # LSTM W_ih (input_size=1)
    Whh = init(keys[5], (4 * Dh, Dh), 1.0 / np.sqrt(Dh))         # LSTM W_hh
    bih = init(keys[6], (4 * Dh,), 0.1)
    bhh = init(keys[7], (4 * Dh,), 0.1)
    fcw = init(keys[8], (1, Eh + 1), 1.0)                        # fc.weight.data.normal_()
    fcb = init(keys[9], (1,), 0.1)
    ffw = init(keys[10], (1, Dh + Eh), 1.0 / np.sqrt(Dh + Eh))   # fc_final
    ffb = init(keys[11], (1,), 0.1)
    return (W1, b1, W2, b2, Wih, Whh, bih, bhh, fcw, fcb, ffw, ffb)


def prepare_kernel_params(raw, Dh, Eh):
    """Host-side re-layout into two consolidated weight slabs."""
    (W1, b1, W2, b2, Wih, Whh, bih, bhh, fcw, fcb, ffw, ffb) = raw
    f32 = jnp.float32
    assert Dh + Eh <= 4 * Dh, "fc_final weight must fit in one 4*Dh-wide row"

    # attention slab: rows [W1_x^T ; W1_d^T ; W1_c^T ; b1 ; w2]  -> (Eh + 2*Dh + 2, Eh)
    w1dT = W1[:, :Dh].T                       # (Dh, Eh)
    w1cT = W1[:, Dh:2 * Dh].T                 # (Dh, Eh)
    w1xT = W1[:, 2 * Dh:].T                   # (Eh, Eh)
    attn_pack = jnp.concatenate(
        [w1xT, w1dT, w1cT, b1[None, :], W2], axis=0).astype(f32)   # b2 dropped (softmax-invariant)

    # fused gate / final slab -> (Dh + Eh + 6, 4*Dh)
    wih = Wih[:, 0]                           # (4Dh,)  input_size=1 -> a vector
    fcw_ctx = fcw[0, :Eh]                     # (Eh,)
    fcw_y = fcw[0, Eh]                        # scalar
    gateW = jnp.concatenate([Whh.T, jnp.outer(fcw_ctx, wih)], axis=0)   # (Dh+Eh, 4Dh)
    g_scale = jnp.full((4 * Dh,), 0.5, f32).at[2 * Dh:3 * Dh].set(1.0)
    g_off = jnp.full((4 * Dh,), 0.5, f32).at[2 * Dh:3 * Dh].set(0.0)
    ffw_pad = jnp.zeros((4 * Dh,), f32).at[:Dh + Eh].set(ffw[0])
    ffb_pad = jnp.full((4 * Dh,), ffb[0], f32)
    gate_pack = jnp.concatenate(
        [gateW,
         (fcw_y * wih)[None, :],
         (fcb[0] * wih + bih + bhh)[None, :],
         g_scale[None, :],
         g_off[None, :],
         ffw_pad[None, :],
         ffb_pad[None, :]], axis=0).astype(f32)

    return attn_pack, gate_pack


def decoder_forward(X_encoded, y_prev, attn_pack, gate_pack):
    B, Tm1, Eh = X_encoded.shape
    args = (X_encoded.astype(jnp.float32), y_prev.astype(jnp.float32),
            attn_pack, gate_pack)
    return pl.pallas_call(
        decoder_kernel,
        out_shape=jax.ShapeDtypeStruct((B, 1), jnp.float32),
        in_specs=[pl.BlockSpec(memory_space=pltpu.MemorySpace.VMEM)] * len(args),
        out_specs=pl.BlockSpec(memory_space=pltpu.MemorySpace.VMEM),
    )(*args)


def decoder_reference(X, y_prev, raw):
    """Pure-JAX reference mirroring the PyTorch forward (for sanity check)."""
    (W1, b1, W2, b2, Wih, Whh, bih, bhh, fcw, fcb, ffw, ffb) = raw
    B, Tm1, Eh = X.shape
    Dh = Whh.shape[1]
    d = jnp.zeros((B, Dh), jnp.float32)
    c = jnp.zeros((B, Dh), jnp.float32)
    ctx = jnp.zeros((B, Eh), jnp.float32)
    for t in range(Tm1):
        drep = jnp.broadcast_to(d[:, None, :], (B, Tm1, Dh))
        crep = jnp.broadcast_to(c[:, None, :], (B, Tm1, Dh))
        x = jnp.concatenate([drep, crep, X], axis=2).reshape(-1, 2 * Dh + Eh)
        h = jnp.tanh(x @ W1.T + b1)
        s = (h @ W2.T + b2).reshape(B, Tm1)
        beta = jax.nn.softmax(s, axis=1)
        ctx = jnp.einsum('bt,bte->be', beta, X)
        y_tilde = jnp.concatenate([ctx, y_prev[:, t:t + 1]], axis=1) @ fcw.T + fcb
        gates = y_tilde @ Wih.T + bih + d @ Whh.T + bhh
        i = jax.nn.sigmoid(gates[:, :Dh])
        f = jax.nn.sigmoid(gates[:, Dh:2 * Dh])
        g = jnp.tanh(gates[:, 2 * Dh:3 * Dh])
        o = jax.nn.sigmoid(gates[:, 3 * Dh:])
        c = f * c + i * g
        d = o * jnp.tanh(c)
    return jnp.concatenate([d, ctx], axis=1) @ ffw.T + ffb


if __name__ == "__main__":
    B, T, Dh, Eh = 2, 8, 32, 32          # batch, T, decoder_num_hidden, encoder_num_hidden
    Tm1 = T - 1

    key = jax.random.PRNGKey(0)
    kx, ky, kp = jax.random.split(key, 3)
    X_encoded = jax.random.normal(kx, (B, Tm1, Eh), jnp.float32)
    y_prev = jax.random.normal(ky, (B, Tm1), jnp.float32)

    raw = make_raw_params(kp, Dh, Eh)
    attn_pack, gate_pack = prepare_kernel_params(raw, Dh, Eh)

    y_pred = decoder_forward(X_encoded, y_prev, attn_pack, gate_pack)
    y_pred = jax.block_until_ready(y_pred)

    y_ref = decoder_reference(X_encoded, y_prev, raw)
    assert y_pred.shape == (B, 1)
    np.testing.assert_allclose(np.asarray(y_pred), np.asarray(y_ref),
                               rtol=2e-2, atol=2e-2)
    print("KERNEL_OK")
</pallas_src>

<mosaic_0001>
module attributes {stable_mosaic.version = 11 : i64} {
  func.func @decoder_kernel(%arg0: memref<2x7x32xf32, #tpu.memory_space<vmem>>, %arg1: memref<2x7xf32, #tpu.memory_space<vmem>>, %arg2: memref<98x32xf32, #tpu.memory_space<vmem>>, %arg3: memref<70x128xf32, #tpu.memory_space<vmem>>, %arg4: memref<2x1xf32, #tpu.memory_space<vmem>>) attributes {dimension_semantics = [], scalar_prefetch = 0 : i64, scratch_operands = 0 : i64, tpu.core_type = #tpu.core_type<tc>} {
    %c0 = arith.constant 0 : index
    %c0_0 = arith.constant 0 : index
    %c0_1 = arith.constant 0 : index
    %0 = vector.load %arg0[%c0, %c0_0, %c0_1] : memref<2x7x32xf32, #tpu.memory_space<vmem>>, vector<2x7x32xf32>
    %c0_2 = arith.constant 0 : index
    %c0_3 = arith.constant 0 : index
    %1 = vector.load %arg1[%c0_2, %c0_3] : memref<2x7xf32, #tpu.memory_space<vmem>>, vector<2x7xf32>
    %c0_4 = arith.constant 0 : index
    %c0_5 = arith.constant 0 : index
    %2 = vector.load %arg2[%c0_4, %c0_5] : memref<98x32xf32, #tpu.memory_space<vmem>>, vector<32x32xf32>
    %c32 = arith.constant 32 : index
    %c0_6 = arith.constant 0 : index
    %3 = vector.load %arg2[%c32, %c0_6] : memref<98x32xf32, #tpu.memory_space<vmem>>, vector<64x32xf32>
    %c96 = arith.constant 96 : index
    %c0_7 = arith.constant 0 : index
    %4 = vector.load %arg2[%c96, %c0_7] : memref<98x32xf32, #tpu.memory_space<vmem>>, vector<1x32xf32>
    %c97 = arith.constant 97 : index
    %c0_8 = arith.constant 0 : index
    %5 = vector.load %arg2[%c97, %c0_8] : memref<98x32xf32, #tpu.memory_space<vmem>>, vector<1x32xf32>
    %6 = vector.shape_cast %5 : vector<1x32xf32> to vector<1x1x32xf32>
    %c0_9 = arith.constant 0 : index
    %c0_10 = arith.constant 0 : index
    %7 = vector.load %arg3[%c0_9, %c0_10] : memref<70x128xf32, #tpu.memory_space<vmem>>, vector<64x128xf32>
    %c64 = arith.constant 64 : index
    %c0_11 = arith.constant 0 : index
    %8 = vector.load %arg3[%c64, %c0_11] : memref<70x128xf32, #tpu.memory_space<vmem>>, vector<1x128xf32>
    %c65 = arith.constant 65 : index
    %c0_12 = arith.constant 0 : index
    %9 = vector.load %arg3[%c65, %c0_12] : memref<70x128xf32, #tpu.memory_space<vmem>>, vector<1x128xf32>
    %c66 = arith.constant 66 : index
    %c0_13 = arith.constant 0 : index
    %10 = vector.load %arg3[%c66, %c0_13] : memref<70x128xf32, #tpu.memory_space<vmem>>, vector<1x128xf32>
    %c67 = arith.constant 67 : index
    %c0_14 = arith.constant 0 : index
    %11 = vector.load %arg3[%c67, %c0_14] : memref<70x128xf32, #tpu.memory_space<vmem>>, vector<1x128xf32>
    %c68 = arith.constant 68 : index
    %c0_15 = arith.constant 0 : index
    %12 = vector.load %arg3[%c68, %c0_15] : memref<70x128xf32, #tpu.memory_space<vmem>>, vector<1x64xf32>
    %c69 = arith.constant 69 : index
    %c0_16 = arith.constant 0 : index
    %13 = vector.load %arg3[%c69, %c0_16] : memref<70x128xf32, #tpu.memory_space<vmem>>, vector<1x1xf32>
    %14 = vector.extract_strided_slice %0 {offsets = [0, 0, 0], sizes = [1, 7, 32], strides = [1, 1, 1]} : vector<2x7x32xf32> to vector<1x7x32xf32>
    %15 = vector.shape_cast %14 : vector<1x7x32xf32> to vector<7x32xf32>
    %cst = arith.constant dense<0.000000e+00> : vector<7x32xf32>
    %16 = tpu.matmul %15, %2, %cst {dimension_numbers = #tpu.dot_dimension_numbers<[1], [0], [0], [1], [0, 0, 1, 1], [], []>} : vector<7x32xf32>, vector<32x32xf32>, vector<7x32xf32> -> vector<7x32xf32>
    %17 = vector.broadcast %4 : vector<1x32xf32> to vector<7x32xf32>
    %18 = arith.addf %16, %17 : vector<7x32xf32>
    %19 = vector.extract_strided_slice %0 {offsets = [1, 0, 0], sizes = [1, 7, 32], strides = [1, 1, 1]} : vector<2x7x32xf32> to vector<1x7x32xf32>
    %20 = vector.shape_cast %19 : vector<1x7x32xf32> to vector<7x32xf32>
    %cst_17 = arith.constant dense<0.000000e+00> : vector<7x32xf32>
    %21 = tpu.matmul %20, %2, %cst_17 {dimension_numbers = #tpu.dot_dimension_numbers<[1], [0], [0], [1], [0, 0, 1, 1], [], []>} : vector<7x32xf32>, vector<32x32xf32>, vector<7x32xf32> -> vector<7x32xf32>
    %22 = vector.broadcast %4 : vector<1x32xf32> to vector<7x32xf32>
    %23 = arith.addf %21, %22 : vector<7x32xf32>
    %24 = vector.shape_cast %18 : vector<7x32xf32> to vector<1x7x32xf32>
    %25 = vector.shape_cast %23 : vector<7x32xf32> to vector<1x7x32xf32>
    %26 = tpu.concatenate %24, %25 in 0 : vector<1x7x32xf32>, vector<1x7x32xf32> -> vector<2x7x32xf32>
    %cst_18 = arith.constant 0.000000e+00 : f32
    %27 = vector.broadcast %cst_18 : f32 to vector<2x32xf32>
    %cst_19 = arith.constant 0.000000e+00 : f32
    %28 = vector.broadcast %cst_19 : f32 to vector<2x32xf32>
    %29 = tpu.concatenate %27, %28 in 1 : vector<2x32xf32>, vector<2x32xf32> -> vector<2x64xf32>
    %cst_20 = arith.constant dense<0.000000e+00> : vector<2x32xf32>
    %30 = tpu.matmul %29, %3, %cst_20 {dimension_numbers = #tpu.dot_dimension_numbers<[1], [0], [0], [1], [0, 0, 1, 1], [], []>} : vector<2x64xf32>, vector<64x32xf32>, vector<2x32xf32> -> vector<2x32xf32>
    %31 = vector.shape_cast %30 : vector<2x32xf32> to vector<2x1x32xf32>
    %32 = vector.broadcast %31 : vector<2x1x32xf32> to vector<2x7x32xf32>
    %33 = arith.addf %26, %32 : vector<2x7x32xf32>
    %34 = math.tanh %33 : vector<2x7x32xf32>
    %35 = vector.broadcast %6 : vector<1x1x32xf32> to vector<2x7x32xf32>
    %36 = arith.mulf %34, %35 : vector<2x7x32xf32>
    %cst_21 = arith.constant dense<0.000000e+00> : vector<2x7xf32>
    %37 = vector.multi_reduction <add>, %36, %cst_21 [2] : vector<2x7x32xf32> to vector<2x7xf32>
    %38 = vector.shape_cast %37 : vector<2x7xf32> to vector<2x7x1xf32>
    %cst_22 = arith.constant dense<0xFF800000> : vector<2x1xf32>
    %39 = vector.multi_reduction <maximumf>, %38, %cst_22 [1] : vector<2x7x1xf32> to vector<2x1xf32>
    %40 = vector.shape_cast %39 : vector<2x1xf32> to vector<2x1x1xf32>
    %41 = vector.broadcast %40 : vector<2x1x1xf32> to vector<2x7x1xf32>
    %42 = arith.subf %38, %41 : vector<2x7x1xf32>
    %43 = math.exp %42 : vector<2x7x1xf32>
    %44 = vector.broadcast %43 : vector<2x7x1xf32> to vector<2x7x32xf32>
    %45 = arith.mulf %44, %0 : vector<2x7x32xf32>
    %cst_23 = arith.constant dense<0.000000e+00> : vector<2x32xf32>
    %46 = vector.multi_reduction <add>, %45, %cst_23 [1] : vector<2x7x32xf32> to vector<2x32xf32>
    %cst_24 = arith.constant dense<0.000000e+00> : vector<2x1xf32>
    %47 = vector.multi_reduction <add>, %43, %cst_24 [1] : vector<2x7x1xf32> to vector<2x1xf32>
    %48 = tpu.reciprocal %47 {approx = true} : vector<2x1xf32> -> vector<2x1xf32>
    %49 = vector.broadcast %48 : vector<2x1xf32> to vector<2x32xf32>
    %50 = arith.mulf %46, %49 : vector<2x32xf32>
    %51 = tpu.concatenate %27, %50 in 1 : vector<2x32xf32>, vector<2x32xf32> -> vector<2x64xf32>
    %cst_25 = arith.constant dense<0.000000e+00> : vector<2x128xf32>
    %52 = tpu.matmul %51, %7, %cst_25 {dimension_numbers = #tpu.dot_dimension_numbers<[1], [0], [0], [1], [0, 0, 1, 1], [], []>} : vector<2x64xf32>, vector<64x128xf32>, vector<2x128xf32> -> vector<2x128xf32>
    %53 = vector.extract_strided_slice %1 {offsets = [0, 0], sizes = [2, 1], strides = [1, 1]} : vector<2x7xf32> to vector<2x1xf32>
    %54 = vector.broadcast %53 : vector<2x1xf32> to vector<2x128xf32>
    %55 = vector.broadcast %8 : vector<1x128xf32> to vector<2x128xf32>
    %56 = arith.mulf %54, %55 : vector<2x128xf32>
    %57 = arith.addf %52, %56 : vector<2x128xf32>
    %58 = vector.broadcast %9 : vector<1x128xf32> to vector<2x128xf32>
    %59 = arith.addf %57, %58 : vector<2x128xf32>
    %60 = vector.broadcast %10 : vector<1x128xf32> to vector<2x128xf32>
    %61 = arith.mulf %59, %60 : vector<2x128xf32>
    %62 = math.tanh %61 : vector<2x128xf32>
    %63 = vector.broadcast %10 : vector<1x128xf32> to vector<2x128xf32>
    %64 = arith.mulf %62, %63 : vector<2x128xf32>
    %65 = vector.broadcast %11 : vector<1x128xf32> to vector<2x128xf32>
    %66 = arith.addf %64, %65 : vector<2x128xf32>
    %67 = vector.extract_strided_slice %66 {offsets = [0, 0], sizes = [2, 32], strides = [1, 1]} : vector<2x128xf32> to vector<2x32xf32>
    %68 = vector.extract_strided_slice %66 {offsets = [0, 32], sizes = [2, 32], strides = [1, 1]} : vector<2x128xf32> to vector<2x32xf32>
    %69 = vector.extract_strided_slice %66 {offsets = [0, 64], sizes = [2, 32], strides = [1, 1]} : vector<2x128xf32> to vector<2x32xf32>
    %70 = vector.extract_strided_slice %66 {offsets = [0, 96], sizes = [2, 32], strides = [1, 1]} : vector<2x128xf32> to vector<2x32xf32>
    %71 = arith.mulf %68, %28 : vector<2x32xf32>
    %72 = arith.mulf %67, %69 : vector<2x32xf32>
    %73 = arith.addf %71, %72 : vector<2x32xf32>
    %74 = math.tanh %73 : vector<2x32xf32>
    %75 = arith.mulf %70, %74 : vector<2x32xf32>
    %76 = tpu.concatenate %75, %73 in 1 : vector<2x32xf32>, vector<2x32xf32> -> vector<2x64xf32>
    %cst_26 = arith.constant dense<0.000000e+00> : vector<2x32xf32>
    %77 = tpu.matmul %76, %3, %cst_26 {dimension_numbers = #tpu.dot_dimension_numbers<[1], [0], [0], [1], [0, 0, 1, 1], [], []>} : vector<2x64xf32>, vector<64x32xf32>, vector<2x32xf32> -> vector<2x32xf32>
    %78 = vector.shape_cast %77 : vector<2x32xf32> to vector<2x1x32xf32>
    %79 = vector.broadcast %78 : vector<2x1x32xf32> to vector<2x7x32xf32>
    %80 = arith.addf %26, %79 : vector<2x7x32xf32>
    %81 = math.tanh %80 : vector<2x7x32xf32>
    %82 = vector.broadcast %6 : vector<1x1x32xf32> to vector<2x7x32xf32>
    %83 = arith.mulf %81, %82 : vector<2x7x32xf32>
    %cst_27 = arith.constant dense<0.000000e+00> : vector<2x7xf32>
    %84 = vector.multi_reduction <add>, %83, %cst_27 [2] : vector<2x7x32xf32> to vector<2x7xf32>
    %85 = vector.shape_cast %84 : vector<2x7xf32> to vector<2x7x1xf32>
    %cst_28 = arith.constant dense<0xFF800000> : vector<2x1xf32>
    %86 = vector.multi_reduction <maximumf>, %85, %cst_28 [1] : vector<2x7x1xf32> to vector<2x1xf32>
    %87 = vector.shape_cast %86 : vector<2x1xf32> to vector<2x1x1xf32>
    %88 = vector.broadcast %87 : vector<2x1x1xf32> to vector<2x7x1xf32>
    %89 = arith.subf %85, %88 : vector<2x7x1xf32>
    %90 = math.exp %89 : vector<2x7x1xf32>
    %91 = vector.broadcast %90 : vector<2x7x1xf32> to vector<2x7x32xf32>
    %92 = arith.mulf %91, %0 : vector<2x7x32xf32>
    %cst_29 = arith.constant dense<0.000000e+00> : vector<2x32xf32>
    %93 = vector.multi_reduction <add>, %92, %cst_29 [1] : vector<2x7x32xf32> to vector<2x32xf32>
    %cst_30 = arith.constant dense<0.000000e+00> : vector<2x1xf32>
    %94 = vector.multi_reduction <add>, %90, %cst_30 [1] : vector<2x7x1xf32> to vector<2x1xf32>
    %95 = tpu.reciprocal %94 {approx = true} : vector<2x1xf32> -> vector<2x1xf32>
    %96 = vector.broadcast %95 : vector<2x1xf32> to vector<2x32xf32>
    %97 = arith.mulf %93, %96 : vector<2x32xf32>
    %98 = tpu.concatenate %75, %97 in 1 : vector<2x32xf32>, vector<2x32xf32> -> vector<2x64xf32>
    %cst_31 = arith.constant dense<0.000000e+00> : vector<2x128xf32>
    %99 = tpu.matmul %98, %7, %cst_31 {dimension_numbers = #tpu.dot_dimension_numbers<[1], [0], [0], [1], [0, 0, 1, 1], [], []>} : vector<2x64xf32>, vector<64x128xf32>, vector<2x128xf32> -> vector<2x128xf32>
    %100 = vector.extract_strided_slice %1 {offsets = [0, 1], sizes = [2, 1], strides = [1, 1]} : vector<2x7xf32> to vector<2x1xf32>
    %101 = vector.broadcast %100 : vector<2x1xf32> to vector<2x128xf32>
    %102 = vector.broadcast %8 : vector<1x128xf32> to vector<2x128xf32>
    %103 = arith.mulf %101, %102 : vector<2x128xf32>
    %104 = arith.addf %99, %103 : vector<2x128xf32>
    %105 = vector.broadcast %9 : vector<1x128xf32> to vector<2x128xf32>
    %106 = arith.addf %104, %105 : vector<2x128xf32>
    %107 = vector.broadcast %10 : vector<1x128xf32> to vector<2x128xf32>
    %108 = arith.mulf %106, %107 : vector<2x128xf32>
    %109 = math.tanh %108 : vector<2x128xf32>
    %110 = vector.broadcast %10 : vector<1x128xf32> to vector<2x128xf32>
    %111 = arith.mulf %109, %110 : vector<2x128xf32>
    %112 = vector.broadcast %11 : vector<1x128xf32> to vector<2x128xf32>
    %113 = arith.addf %111, %112 : vector<2x128xf32>
    %114 = vector.extract_strided_slice %113 {offsets = [0, 0], sizes = [2, 32], strides = [1, 1]} : vector<2x128xf32> to vector<2x32xf32>
    %115 = vector.extract_strided_slice %113 {offsets = [0, 32], sizes = [2, 32], strides = [1, 1]} : vector<2x128xf32> to vector<2x32xf32>
    %116 = vector.extract_strided_slice %113 {offsets = [0, 64], sizes = [2, 32], strides = [1, 1]} : vector<2x128xf32> to vector<2x32xf32>
    %117 = vector.extract_strided_slice %113 {offsets = [0, 96], sizes = [2, 32], strides = [1, 1]} : vector<2x128xf32> to vector<2x32xf32>
    %118 = arith.mulf %115, %73 : vector<2x32xf32>
    %119 = arith.mulf %114, %116 : vector<2x32xf32>
    %120 = arith.addf %118, %119 : vector<2x32xf32>
    %121 = math.tanh %120 : vector<2x32xf32>
    %122 = arith.mulf %117, %121 : vector<2x32xf32>
    %123 = tpu.concatenate %122, %120 in 1 : vector<2x32xf32>, vector<2x32xf32> -> vector<2x64xf32>
    %cst_32 = arith.constant dense<0.000000e+00> : vector<2x32xf32>
    %124 = tpu.matmul %123, %3, %cst_32 {dimension_numbers = #tpu.dot_dimension_numbers<[1], [0], [0], [1], [0, 0, 1, 1], [], []>} : vector<2x64xf32>, vector<64x32xf32>, vector<2x32xf32> -> vector<2x32xf32>
    %125 = vector.shape_cast %124 : vector<2x32xf32> to vector<2x1x32xf32>
    %126 = vector.broadcast %125 : vector<2x1x32xf32> to vector<2x7x32xf32>
    %127 = arith.addf %26, %126 : vector<2x7x32xf32>
    %128 = math.tanh %127 : vector<2x7x32xf32>
    %129 = vector.broadcast %6 : vector<1x1x32xf32> to vector<2x7x32xf32>
    %130 = arith.mulf %128, %129 : vector<2x7x32xf32>
    %cst_33 = arith.constant dense<0.000000e+00> : vector<2x7xf32>
    %131 = vector.multi_reduction <add>, %130, %cst_33 [2] : vector<2x7x32xf32> to vector<2x7xf32>
    %132 = vector.shape_cast %131 : vector<2x7xf32> to vector<2x7x1xf32>
    %cst_34 = arith.constant dense<0xFF800000> : vector<2x1xf32>
    %133 = vector.multi_reduction <maximumf>, %132, %cst_34 [1] : vector<2x7x1xf32> to vector<2x1xf32>
    %134 = vector.shape_cast %133 : vector<2x1xf32> to vector<2x1x1xf32>
    %135 = vector.broadcast %134 : vector<2x1x1xf32> to vector<2x7x1xf32>
    %136 = arith.subf %132, %135 : vector<2x7x1xf32>
    %137 = math.exp %136 : vector<2x7x1xf32>
    %138 = vector.broadcast %137 : vector<2x7x1xf32> to vector<2x7x32xf32>
    %139 = arith.mulf %138, %0 : vector<2x7x32xf32>
    %cst_35 = arith.constant dense<0.000000e+00> : vector<2x32xf32>
    %140 = vector.multi_reduction <add>, %139, %cst_35 [1] : vector<2x7x32xf32> to vector<2x32xf32>
    %cst_36 = arith.constant dense<0.000000e+00> : vector<2x1xf32>
    %141 = vector.multi_reduction <add>, %137, %cst_36 [1] : vector<2x7x1xf32> to vector<2x1xf32>
    %142 = tpu.reciprocal %141 {approx = true} : vector<2x1xf32> -> vector<2x1xf32>
    %143 = vector.broadcast %142 : vector<2x1xf32> to vector<2x32xf32>
    %144 = arith.mulf %140, %143 : vector<2x32xf32>
    %145 = tpu.concatenate %122, %144 in 1 : vector<2x32xf32>, vector<2x32xf32> -> vector<2x64xf32>
    %cst_37 = arith.constant dense<0.000000e+00> : vector<2x128xf32>
    %146 = tpu.matmul %145, %7, %cst_37 {dimension_numbers = #tpu.dot_dimension_numbers<[1], [0], [0], [1], [0, 0, 1, 1], [], []>} : vector<2x64xf32>, vector<64x128xf32>, vector<2x128xf32> -> vector<2x128xf32>
    %147 = vector.extract_strided_slice %1 {offsets = [0, 2], sizes = [2, 1], strides = [1, 1]} : vector<2x7xf32> to vector<2x1xf32>
    %148 = vector.broadcast %147 : vector<2x1xf32> to vector<2x128xf32>
    %149 = vector.broadcast %8 : vector<1x128xf32> to vector<2x128xf32>
    %150 = arith.mulf %148, %149 : vector<2x128xf32>
    %151 = arith.addf %146, %150 : vector<2x128xf32>
    %152 = vector.broadcast %9 : vector<1x128xf32> to vector<2x128xf32>
    %153 = arith.addf %151, %152 : vector<2x128xf32>
    %154 = vector.broadcast %10 : vector<1x128xf32> to vector<2x128xf32>
    %155 = arith.mulf %153, %154 : vector<2x128xf32>
    %156 = math.tanh %155 : vector<2x128xf32>
    %157 = vector.broadcast %10 : vector<1x128xf32> to vector<2x128xf32>
    %158 = arith.mulf %156, %157 : vector<2x128xf32>
    %159 = vector.broadcast %11 : vector<1x128xf32> to vector<2x128xf32>
    %160 = arith.addf %158, %159 : vector<2x128xf32>
    %161 = vector.extract_strided_slice %160 {offsets = [0, 0], sizes = [2, 32], strides = [1, 1]} : vector<2x128xf32> to vector<2x32xf32>
    %162 = vector.extract_strided_slice %160 {offsets = [0, 32], sizes = [2, 32], strides = [1, 1]} : vector<2x128xf32> to vector<2x32xf32>
    %163 = vector.extract_strided_slice %160 {offsets = [0, 64], sizes = [2, 32], strides = [1, 1]} : vector<2x128xf32> to vector<2x32xf32>
    %164 = vector.extract_strided_slice %160 {offsets = [0, 96], sizes = [2, 32], strides = [1, 1]} : vector<2x128xf32> to vector<2x32xf32>
    %165 = arith.mulf %162, %120 : vector<2x32xf32>
    %166 = arith.mulf %161, %163 : vector<2x32xf32>
    %167 = arith.addf %165, %166 : vector<2x32xf32>
    %168 = math.tanh %167 : vector<2x32xf32>
    %169 = arith.mulf %164, %168 : vector<2x32xf32>
    %170 = tpu.concatenate %169, %167 in 1 : vector<2x32xf32>, vector<2x32xf32> -> vector<2x64xf32>
    %cst_38 = arith.constant dense<0.000000e+00> : vector<2x32xf32>
    %171 = tpu.matmul %170, %3, %cst_38 {dimension_numbers = #tpu.dot_dimension_numbers<[1], [0], [0], [1], [0, 0, 1, 1], [], []>} : vector<2x64xf32>, vector<64x32xf32>, vector<2x32xf32> -> vector<2x32xf32>
    %172 = vector.shape_cast %171 : vector<2x32xf32> to vector<2x1x32xf32>
    %173 = vector.broadcast %172 : vector<2x1x32xf32> to vector<2x7x32xf32>
    %174 = arith.addf %26, %173 : vector<2x7x32xf32>
    %175 = math.tanh %174 : vector<2x7x32xf32>
    %176 = vector.broadcast %6 : vector<1x1x32xf32> to vector<2x7x32xf32>
    %177 = arith.mulf %175, %176 : vector<2x7x32xf32>
    %cst_39 = arith.constant dense<0.000000e+00> : vector<2x7xf32>
    %178 = vector.multi_reduction <add>, %177, %cst_39 [2] : vector<2x7x32xf32> to vector<2x7xf32>
    %179 = vector.shape_cast %178 : vector<2x7xf32> to vector<2x7x1xf32>
    %cst_40 = arith.constant dense<0xFF800000> : vector<2x1xf32>
    %180 = vector.multi_reduction <maximumf>, %179, %cst_40 [1] : vector<2x7x1xf32> to vector<2x1xf32>
    %181 = vector.shape_cast %180 : vector<2x1xf32> to vector<2x1x1xf32>
    %182 = vector.broadcast %181 : vector<2x1x1xf32> to vector<2x7x1xf32>
    %183 = arith.subf %179, %182 : vector<2x7x1xf32>
    %184 = math.exp %183 : vector<2x7x1xf32>
    %185 = vector.broadcast %184 : vector<2x7x1xf32> to vector<2x7x32xf32>
    %186 = arith.mulf %185, %0 : vector<2x7x32xf32>
    %cst_41 = arith.constant dense<0.000000e+00> : vector<2x32xf32>
    %187 = vector.multi_reduction <add>, %186, %cst_41 [1] : vector<2x7x32xf32> to vector<2x32xf32>
    %cst_42 = arith.constant dense<0.000000e+00> : vector<2x1xf32>
    %188 = vector.multi_reduction <add>, %184, %cst_42 [1] : vector<2x7x1xf32> to vector<2x1xf32>
    %189 = tpu.reciprocal %188 {approx = true} : vector<2x1xf32> -> vector<2x1xf32>
    %190 = vector.broadcast %189 : vector<2x1xf32> to vector<2x32xf32>
    %191 = arith.mulf %187, %190 : vector<2x32xf32>
    %192 = tpu.concatenate %169, %191 in 1 : vector<2x32xf32>, vector<2x32xf32> -> vector<2x64xf32>
    %cst_43 = arith.constant dense<0.000000e+00> : vector<2x128xf32>
    %193 = tpu.matmul %192, %7, %cst_43 {dimension_numbers = #tpu.dot_dimension_numbers<[1], [0], [0], [1], [0, 0, 1, 1], [], []>} : vector<2x64xf32>, vector<64x128xf32>, vector<2x128xf32> -> vector<2x128xf32>
    %194 = vector.extract_strided_slice %1 {offsets = [0, 3], sizes = [2, 1], strides = [1, 1]} : vector<2x7xf32> to vector<2x1xf32>
    %195 = vector.broadcast %194 : vector<2x1xf32> to vector<2x128xf32>
    %196 = vector.broadcast %8 : vector<1x128xf32> to vector<2x128xf32>
    %197 = arith.mulf %195, %196 : vector<2x128xf32>
    %198 = arith.addf %193, %197 : vector<2x128xf32>
    %199 = vector.broadcast %9 : vector<1x128xf32> to vector<2x128xf32>
    %200 = arith.addf %198, %199 : vector<2x128xf32>
    %201 = vector.broadcast %10 : vector<1x128xf32> to vector<2x128xf32>
    %202 = arith.mulf %200, %201 : vector<2x128xf32>
    %203 = math.tanh %202 : vector<2x128xf32>
    %204 = vector.broadcast %10 : vector<1x128xf32> to vector<2x128xf32>
    %205 = arith.mulf %203, %204 : vector<2x128xf32>
    %206 = vector.broadcast %11 : vector<1x128xf32> to vector<2x128xf32>
    %207 = arith.addf %205, %206 : vector<2x128xf32>
    %208 = vector.extract_strided_slice %207 {offsets = [0, 0], sizes = [2, 32], strides = [1, 1]} : vector<2x128xf32> to vector<2x32xf32>
    %209 = vector.extract_strided_slice %207 {offsets = [0, 32], sizes = [2, 32], strides = [1, 1]} : vector<2x128xf32> to vector<2x32xf32>
    %210 = vector.extract_strided_slice %207 {offsets = [0, 64], sizes = [2, 32], strides = [1, 1]} : vector<2x128xf32> to vector<2x32xf32>
    %211 = vector.extract_strided_slice %207 {offsets = [0, 96], sizes = [2, 32], strides = [1, 1]} : vector<2x128xf32> to vector<2x32xf32>
    %212 = arith.mulf %209, %167 : vector<2x32xf32>
    %213 = arith.mulf %208, %210 : vector<2x32xf32>
    %214 = arith.addf %212, %213 : vector<2x32xf32>
    %215 = math.tanh %214 : vector<2x32xf32>
    %216 = arith.mulf %211, %215 : vector<2x32xf32>
    %217 = tpu.concatenate %216, %214 in 1 : vector<2x32xf32>, vector<2x32xf32> -> vector<2x64xf32>
    %cst_44 = arith.constant dense<0.000000e+00> : vector<2x32xf32>
    %218 = tpu.matmul %217, %3, %cst_44 {dimension_numbers = #tpu.dot_dimension_numbers<[1], [0], [0], [1], [0, 0, 1, 1], [], []>} : vector<2x64xf32>, vector<64x32xf32>, vector<2x32xf32> -> vector<2x32xf32>
    %219 = vector.shape_cast %218 : vector<2x32xf32> to vector<2x1x32xf32>
    %220 = vector.broadcast %219 : vector<2x1x32xf32> to vector<2x7x32xf32>
    %221 = arith.addf %26, %220 : vector<2x7x32xf32>
    %222 = math.tanh %221 : vector<2x7x32xf32>
    %223 = vector.broadcast %6 : vector<1x1x32xf32> to vector<2x7x32xf32>
    %224 = arith.mulf %222, %223 : vector<2x7x32xf32>
    %cst_45 = arith.constant dense<0.000000e+00> : vector<2x7xf32>
    %225 = vector.multi_reduction <add>, %224, %cst_45 [2] : vector<2x7x32xf32> to vector<2x7xf32>
    %226 = vector.shape_cast %225 : vector<2x7xf32> to vector<2x7x1xf32>
    %cst_46 = arith.constant dense<0xFF800000> : vector<2x1xf32>
    %227 = vector.multi_reduction <maximumf>, %226, %cst_46 [1] : vector<2x7x1xf32> to vector<2x1xf32>
    %228 = vector.shape_cast %227 : vector<2x1xf32> to vector<2x1x1xf32>
    %229 = vector.broadcast %228 : vector<2x1x1xf32> to vector<2x7x1xf32>
    %230 = arith.subf %226, %229 : vector<2x7x1xf32>
    %231 = math.exp %230 : vector<2x7x1xf32>
    %232 = vector.broadcast %231 : vector<2x7x1xf32> to vector<2x7x32xf32>
    %233 = arith.mulf %232, %0 : vector<2x7x32xf32>
    %cst_47 = arith.constant dense<0.000000e+00> : vector<2x32xf32>
    %234 = vector.multi_reduction <add>, %233, %cst_47 [1] : vector<2x7x32xf32> to vector<2x32xf32>
    %cst_48 = arith.constant dense<0.000000e+00> : vector<2x1xf32>
    %235 = vector.multi_reduction <add>, %231, %cst_48 [1] : vector<2x7x1xf32> to vector<2x1xf32>
    %236 = tpu.reciprocal %235 {approx = true} : vector<2x1xf32> -> vector<2x1xf32>
    %237 = vector.broadcast %236 : vector<2x1xf32> to vector<2x32xf32>
    %238 = arith.mulf %234, %237 : vector<2x32xf32>
    %239 = tpu.concatenate %216, %238 in 1 : vector<2x32xf32>, vector<2x32xf32> -> vector<2x64xf32>
    %cst_49 = arith.constant dense<0.000000e+00> : vector<2x128xf32>
    %240 = tpu.matmul %239, %7, %cst_49 {dimension_numbers = #tpu.dot_dimension_numbers<[1], [0], [0], [1], [0, 0, 1, 1], [], []>} : vector<2x64xf32>, vector<64x128xf32>, vector<2x128xf32> -> vector<2x128xf32>
    %241 = vector.extract_strided_slice %1 {offsets = [0, 4], sizes = [2, 1], strides = [1, 1]} : vector<2x7xf32> to vector<2x1xf32>
    %242 = vector.broadcast %241 : vector<2x1xf32> to vector<2x128xf32>
    %243 = vector.broadcast %8 : vector<1x128xf32> to vector<2x128xf32>
    %244 = arith.mulf %242, %243 : vector<2x128xf32>
    %245 = arith.addf %240, %244 : vector<2x128xf32>
    %246 = vector.broadcast %9 : vector<1x128xf32> to vector<2x128xf32>
    %247 = arith.addf %245, %246 : vector<2x128xf32>
    %248 = vector.broadcast %10 : vector<1x128xf32> to vector<2x128xf32>
    %249 = arith.mulf %247, %248 : vector<2x128xf32>
    %250 = math.tanh %249 : vector<2x128xf32>
    %251 = vector.broadcast %10 : vector<1x128xf32> to vector<2x128xf32>
    %252 = arith.mulf %250, %251 : vector<2x128xf32>
    %253 = vector.broadcast %11 : vector<1x128xf32> to vector<2x128xf32>
    %254 = arith.addf %252, %253 : vector<2x128xf32>
    %255 = vector.extract_strided_slice %254 {offsets = [0, 0], sizes = [2, 32], strides = [1, 1]} : vector<2x128xf32> to vector<2x32xf32>
    %256 = vector.extract_strided_slice %254 {offsets = [0, 32], sizes = [2, 32], strides = [1, 1]} : vector<2x128xf32> to vector<2x32xf32>
    %257 = vector.extract_strided_slice %254 {offsets = [0, 64], sizes = [2, 32], strides = [1, 1]} : vector<2x128xf32> to vector<2x32xf32>
    %258 = vector.extract_strided_slice %254 {offsets = [0, 96], sizes = [2, 32], strides = [1, 1]} : vector<2x128xf32> to vector<2x32xf32>
    %259 = arith.mulf %256, %214 : vector<2x32xf32>
    %260 = arith.mulf %255, %257 : vector<2x32xf32>
    %261 = arith.addf %259, %260 : vector<2x32xf32>
    %262 = math.tanh %261 : vector<2x32xf32>
    %263 = arith.mulf %258, %262 : vector<2x32xf32>
    %264 = tpu.concatenate %263, %261 in 1 : vector<2x32xf32>, vector<2x32xf32> -> vector<2x64xf32>
    %cst_50 = arith.constant dense<0.000000e+00> : vector<2x32xf32>
    %265 = tpu.matmul %264, %3, %cst_50 {dimension_numbers = #tpu.dot_dimension_numbers<[1], [0], [0], [1], [0, 0, 1, 1], [], []>} : vector<2x64xf32>, vector<64x32xf32>, vector<2x32xf32> -> vector<2x32xf32>
    %266 = vector.shape_cast %265 : vector<2x32xf32> to vector<2x1x32xf32>
    %267 = vector.broadcast %266 : vector<2x1x32xf32> to vector<2x7x32xf32>
    %268 = arith.addf %26, %267 : vector<2x7x32xf32>
    %269 = math.tanh %268 : vector<2x7x32xf32>
    %270 = vector.broadcast %6 : vector<1x1x32xf32> to vector<2x7x32xf32>
    %271 = arith.mulf %269, %270 : vector<2x7x32xf32>
    %cst_51 = arith.constant dense<0.000000e+00> : vector<2x7xf32>
    %272 = vector.multi_reduction <add>, %271, %cst_51 [2] : vector<2x7x32xf32> to vector<2x7xf32>
    %273 = vector.shape_cast %272 : vector<2x7xf32> to vector<2x7x1xf32>
    %cst_52 = arith.constant dense<0xFF800000> : vector<2x1xf32>
    %274 = vector.multi_reduction <maximumf>, %273, %cst_52 [1] : vector<2x7x1xf32> to vector<2x1xf32>
    %275 = vector.shape_cast %274 : vector<2x1xf32> to vector<2x1x1xf32>
    %276 = vector.broadcast %275 : vector<2x1x1xf32> to vector<2x7x1xf32>
    %277 = arith.subf %273, %276 : vector<2x7x1xf32>
    %278 = math.exp %277 : vector<2x7x1xf32>
    %279 = vector.broadcast %278 : vector<2x7x1xf32> to vector<2x7x32xf32>
    %280 = arith.mulf %279, %0 : vector<2x7x32xf32>
    %cst_53 = arith.constant dense<0.000000e+00> : vector<2x32xf32>
    %281 = vector.multi_reduction <add>, %280, %cst_53 [1] : vector<2x7x32xf32> to vector<2x32xf32>
    %cst_54 = arith.constant dense<0.000000e+00> : vector<2x1xf32>
    %282 = vector.multi_reduction <add>, %278, %cst_54 [1] : vector<2x7x1xf32> to vector<2x1xf32>
    %283 = tpu.reciprocal %282 {approx = true} : vector<2x1xf32> -> vector<2x1xf32>
    %284 = vector.broadcast %283 : vector<2x1xf32> to vector<2x32xf32>
    %285 = arith.mulf %281, %284 : vector<2x32xf32>
    %286 = tpu.concatenate %263, %285 in 1 : vector<2x32xf32>, vector<2x32xf32> -> vector<2x64xf32>
    %cst_55 = arith.constant dense<0.000000e+00> : vector<2x128xf32>
    %287 = tpu.matmul %286, %7, %cst_55 {dimension_numbers = #tpu.dot_dimension_numbers<[1], [0], [0], [1], [0, 0, 1, 1], [], []>} : vector<2x64xf32>, vector<64x128xf32>, vector<2x128xf32> -> vector<2x128xf32>
    %288 = vector.extract_strided_slice %1 {offsets = [0, 5], sizes = [2, 1], strides = [1, 1]} : vector<2x7xf32> to vector<2x1xf32>
    %289 = vector.broadcast %288 : vector<2x1xf32> to vector<2x128xf32>
    %290 = vector.broadcast %8 : vector<1x128xf32> to vector<2x128xf32>
    %291 = arith.mulf %289, %290 : vector<2x128xf32>
    %292 = arith.addf %287, %291 : vector<2x128xf32>
    %293 = vector.broadcast %9 : vector<1x128xf32> to vector<2x128xf32>
    %294 = arith.addf %292, %293 : vector<2x128xf32>
    %295 = vector.broadcast %10 : vector<1x128xf32> to vector<2x128xf32>
    %296 = arith.mulf %294, %295 : vector<2x128xf32>
    %297 = math.tanh %296 : vector<2x128xf32>
    %298 = vector.broadcast %10 : vector<1x128xf32> to vector<2x128xf32>
    %299 = arith.mulf %297, %298 : vector<2x128xf32>
    %300 = vector.broadcast %11 : vector<1x128xf32> to vector<2x128xf32>
    %301 = arith.addf %299, %300 : vector<2x128xf32>
    %302 = vector.extract_strided_slice %301 {offsets = [0, 0], sizes = [2, 32], strides = [1, 1]} : vector<2x128xf32> to vector<2x32xf32>
    %303 = vector.extract_strided_slice %301 {offsets = [0, 32], sizes = [2, 32], strides = [1, 1]} : vector<2x128xf32> to vector<2x32xf32>
    %304 = vector.extract_strided_slice %301 {offsets = [0, 64], sizes = [2, 32], strides = [1, 1]} : vector<2x128xf32> to vector<2x32xf32>
    %305 = vector.extract_strided_slice %301 {offsets = [0, 96], sizes = [2, 32], strides = [1, 1]} : vector<2x128xf32> to vector<2x32xf32>
    %306 = arith.mulf %303, %261 : vector<2x32xf32>
    %307 = arith.mulf %302, %304 : vector<2x32xf32>
    %308 = arith.addf %306, %307 : vector<2x32xf32>
    %309 = math.tanh %308 : vector<2x32xf32>
    %310 = arith.mulf %305, %309 : vector<2x32xf32>
    %311 = tpu.concatenate %310, %308 in 1 : vector<2x32xf32>, vector<2x32xf32> -> vector<2x64xf32>
    %cst_56 = arith.constant dense<0.000000e+00> : vector<2x32xf32>
    %312 = tpu.matmul %311, %3, %cst_56 {dimension_numbers = #tpu.dot_dimension_numbers<[1], [0], [0], [1], [0, 0, 1, 1], [], []>} : vector<2x64xf32>, vector<64x32xf32>, vector<2x32xf32> -> vector<2x32xf32>
    %313 = vector.shape_cast %312 : vector<2x32xf32> to vector<2x1x32xf32>
    %314 = vector.broadcast %313 : vector<2x1x32xf32> to vector<2x7x32xf32>
    %315 = arith.addf %26, %314 : vector<2x7x32xf32>
    %316 = math.tanh %315 : vector<2x7x32xf32>
    %317 = vector.broadcast %6 : vector<1x1x32xf32> to vector<2x7x32xf32>
    %318 = arith.mulf %316, %317 : vector<2x7x32xf32>
    %cst_57 = arith.constant dense<0.000000e+00> : vector<2x7xf32>
    %319 = vector.multi_reduction <add>, %318, %cst_57 [2] : vector<2x7x32xf32> to vector<2x7xf32>
    %320 = vector.shape_cast %319 : vector<2x7xf32> to vector<2x7x1xf32>
    %cst_58 = arith.constant dense<0xFF800000> : vector<2x1xf32>
    %321 = vector.multi_reduction <maximumf>, %320, %cst_58 [1] : vector<2x7x1xf32> to vector<2x1xf32>
    %322 = vector.shape_cast %321 : vector<2x1xf32> to vector<2x1x1xf32>
    %323 = vector.broadcast %322 : vector<2x1x1xf32> to vector<2x7x1xf32>
    %324 = arith.subf %320, %323 : vector<2x7x1xf32>
    %325 = math.exp %324 : vector<2x7x1xf32>
    %326 = vector.broadcast %325 : vector<2x7x1xf32> to vector<2x7x32xf32>
    %327 = arith.mulf %326, %0 : vector<2x7x32xf32>
    %cst_59 = arith.constant dense<0.000000e+00> : vector<2x32xf32>
    %328 = vector.multi_reduction <add>, %327, %cst_59 [1] : vector<2x7x32xf32> to vector<2x32xf32>
    %cst_60 = arith.constant dense<0.000000e+00> : vector<2x1xf32>
    %329 = vector.multi_reduction <add>, %325, %cst_60 [1] : vector<2x7x1xf32> to vector<2x1xf32>
    %330 = tpu.reciprocal %329 {approx = true} : vector<2x1xf32> -> vector<2x1xf32>
    %331 = vector.broadcast %330 : vector<2x1xf32> to vector<2x32xf32>
    %332 = arith.mulf %328, %331 : vector<2x32xf32>
    %333 = tpu.concatenate %310, %332 in 1 : vector<2x32xf32>, vector<2x32xf32> -> vector<2x64xf32>
    %cst_61 = arith.constant dense<0.000000e+00> : vector<2x128xf32>
    %334 = tpu.matmul %333, %7, %cst_61 {dimension_numbers = #tpu.dot_dimension_numbers<[1], [0], [0], [1], [0, 0, 1, 1], [], []>} : vector<2x64xf32>, vector<64x128xf32>, vector<2x128xf32> -> vector<2x128xf32>
    %335 = vector.extract_strided_slice %1 {offsets = [0, 6], sizes = [2, 1], strides = [1, 1]} : vector<2x7xf32> to vector<2x1xf32>
    %336 = vector.broadcast %335 : vector<2x1xf32> to vector<2x128xf32>
    %337 = vector.broadcast %8 : vector<1x128xf32> to vector<2x128xf32>
    %338 = arith.mulf %336, %337 : vector<2x128xf32>
    %339 = arith.addf %334, %338 : vector<2x128xf32>
    %340 = vector.broadcast %9 : vector<1x128xf32> to vector<2x128xf32>
    %341 = arith.addf %339, %340 : vector<2x128xf32>
    %342 = vector.broadcast %10 : vector<1x128xf32> to vector<2x128xf32>
    %343 = arith.mulf %341, %342 : vector<2x128xf32>
    %344 = math.tanh %343 : vector<2x128xf32>
    %345 = vector.broadcast %10 : vector<1x128xf32> to vector<2x128xf32>
    %346 = arith.mulf %344, %345 : vector<2x128xf32>
    %347 = vector.broadcast %11 : vector<1x128xf32> to vector<2x128xf32>
    %348 = arith.addf %346, %347 : vector<2x128xf32>
    %349 = vector.extract_strided_slice %348 {offsets = [0, 0], sizes = [2, 32], strides = [1, 1]} : vector<2x128xf32> to vector<2x32xf32>
    %350 = vector.extract_strided_slice %348 {offsets = [0, 32], sizes = [2, 32], strides = [1, 1]} : vector<2x128xf32> to vector<2x32xf32>
    %351 = vector.extract_strided_slice %348 {offsets = [0, 64], sizes = [2, 32], strides = [1, 1]} : vector<2x128xf32> to vector<2x32xf32>
    %352 = vector.extract_strided_slice %348 {offsets = [0, 96], sizes = [2, 32], strides = [1, 1]} : vector<2x128xf32> to vector<2x32xf32>
    %353 = arith.mulf %350, %308 : vector<2x32xf32>
    %354 = arith.mulf %349, %351 : vector<2x32xf32>
    %355 = arith.addf %353, %354 : vector<2x32xf32>
    %356 = math.tanh %355 : vector<2x32xf32>
    %357 = arith.mulf %352, %356 : vector<2x32xf32>
    %358 = tpu.concatenate %357, %332 in 1 : vector<2x32xf32>, vector<2x32xf32> -> vector<2x64xf32>
    %359 = vector.broadcast %12 : vector<1x64xf32> to vector<2x64xf32>
    %360 = arith.mulf %358, %359 : vector<2x64xf32>
    %cst_62 = arith.constant dense<0.000000e+00> : vector<2xf32>
    %361 = vector.multi_reduction <add>, %360, %cst_62 [1] : vector<2x64xf32> to vector<2xf32>
    %362 = vector.shape_cast %361 : vector<2xf32> to vector<2x1xf32>
    %363 = vector.broadcast %13 : vector<1x1xf32> to vector<2x1xf32>
    %364 = arith.addf %362, %363 : vector<2x1xf32>
    %c0_63 = arith.constant 0 : index
    %c0_64 = arith.constant 0 : index
    %365 = vector.load %arg4[%c0_63, %c0_64] : memref<2x1xf32, #tpu.memory_space<vmem>>, vector<2x1xf32>
    tpu.vector_store %arg4[%c0_63, %c0_64], %364 {strides = array<i32>} : memref<2x1xf32, #tpu.memory_space<vmem>>, vector<2x1xf32>,
    return
  }
}

</mosaic_0001>

<bundles_post_ra>
// kernel: tpu_custom_call.1
= control target key start
LH: loop header
LB: loop body
LE: loop exit
PB: predicated region body
PF: predicated region fallthrough
CT: control target
= control target key end

     0   :  { %v2999_v0 = vmov 0.0|0.0   ;;  %vm3000_vm0 = vmmov 0   ;;  %v3001_v4 = vmov 0.0   ;;  %vm52_vm1 = vcmask 261120   ;;  %s3004_s11 = smov 32   ;;  %s3005_s22 = smov 64   ;;  %s3664_s2 = inlined_call_operand.vmem [shape: f32[98,32], index: 2, kind: input, shape index: {}]   ;;  %s3665_s0 = inlined_call_operand.vmem [shape: f32[2,7,32], index: 0, kind: input, shape index: {}]   ;;  %s3666_s3 = inlined_call_operand.vmem [shape: f32[70,128], index: 3, kind: input, shape index: {}]   ;;  %s3667_s1 = inlined_call_operand.vmem [shape: f32[2,7], index: 1, kind: input, shape index: {}]   ;;  %s3668_s4 = inlined_call_operand.vmem [shape: f32[2,1], index: 4, kind: output, shape index: {}]  }
   0x1   :  { %2679 = vmatprep.subr.bf16.mxu0 %v2999_v0  ;;  %v20_v1 = vld [vmem:[%s3664_s2] sm:$0xff]  ;;  %v21_v2 = vld [vmem:[%s3664_s2 + $0x8] sm:$0xff]  ;;  %v22_v3 = vld [vmem:[%s3664_s2 + $0x10] sm:$0xff]  ;;  %2399 = vmatprep.mubr.msk.f32.mxu0 %vm3000_vm0, %v3001_v4  ;;  %v3002_v26 = vmov 1966171168   ;;  %v277_v28 = vlaneseq  ;;  %vm316_vm2 = vcmask 260096  }
   0x2   :  { %v2680_v5 = vpack.c.bf16 %v21_v2, %v20_v1  ;;  %v23_v6 = vld [vmem:[%s3664_s2 + $0x18] sm:$0xff]  ;;  %2685 = vmatprep.subr.bf16.mxu1 %v2999_v0  ;;  %2410 = vmatprep.mubr.msk.f32.mxu1 %vm3000_vm0, %v3001_v4  ;;  %v24_v8 = vld [vmem:[%s3664_s2 + $0x20] sm:$0xff]  ;;  %v25_v9 = vld [vmem:[%s3664_s2 + $0x28] sm:$0xff]  ;;  %v275_v27 = vunpack.c.l.s4 %v3002_v26  ;;  %vm323_vm3 = vcmask 1046528   ;;  %vm380_vm4 = vcmask 1041409  }
   0x3   :  { %v2683_v7 = vpack.c.bf16 %v23_v6, %v22_v3  ;;  %v3066_v10 = vld [vmem:[%s3665_s0] sm:$0x7f]  ;;  %v3068_v11 = vpack.c.bf16 %v25_v9, %v24_v8  ;;  %v3073_v12 = vld [vmem:[%s3665_s0 + $0x8] sm:$0x7f]  ;;  %v26_v13 = vld [vmem:[%s3664_s2 + $0x30] sm:$0xff]  ;;  %v278_v30 = vshrl.u32 %v277_v28, 7 }
   0x4   :  { %2681 = vmatpush3.bf16.msra.mxu0 %v2680_v5  ;;  %2687 = vmatpush3.bf16.msra.mxu1 %v2680_v5  ;;  %v27_v14 = vld [vmem:[%s3664_s2 + $0x38] sm:$0xff]  ;;  %v28_v16 = vld [vmem:[%s3664_s2 + $0x40] sm:$0xff]  ;;  %v29_v17 = vld [vmem:[%s3664_s2 + $0x48] sm:$0xff]  ;;  %v276_v29 = vunpack.c.0.s8 %v275_v27  ;;  %vm199_vm5 = vcmask 523264   ;;  %vm2217_vm6 = vcmask 517120   ;;  %vm2226_vm7 = vcmask 1024  }
   0x5   :  { %2682 = vmatprep.subr.bf16.mxu0 %v2999_v0  ;;  %2688 = vmatprep.subr.bf16.mxu1 %v2999_v0  ;;  %v3088_v15 = vpack.c.bf16 %v27_v14, %v26_v13  ;;  %v3102_v18 = vpack.c.bf16 %v29_v17, %v28_v16  ;;  %v30_v19 = vld [vmem:[%s3664_s2 + $0x50] sm:$0xff]  ;;  %v31_v20 = vld [vmem:[%s3664_s2 + $0x58] sm:$0xff]  ;;  %v3131_v34 = vsub.s32 0, %v278_v30  ;;  %v2232_v36 = vld [vmem:[%s3664_s2 + $0x60] ss:$0 sm:$0xff] }
   0x6   :  { %v3112_v21 = vpack.c.bf16 %v31_v20, %v30_v19  ;;  %v3128_v31 = vsub.s32 %v276_v29, %v278_v30  ;;  %v3149_v46 = vld [vmem:[%s3664_s2 + $0x61] ss:$0 sm:$0xff]  ;;  %v35_v54 = vld [vmem:[%s3666_s3 + $0x8] sm:$0xff]  ;;  %v36_v55 = vld [vmem:[%s3666_s3 + $0x10] sm:$0xff] }
   0x7   :  { %v34_v53 = vld [vmem:[%s3666_s3] sm:$0xff]  ;;  %v37_v57 = vld [vmem:[%s3666_s3 + $0x18] sm:$0xff]  ;;  %v39_v60 = vld [vmem:[%s3666_s3 + $0x28] sm:$0xff] }
   0x8   :  { %2684 = vmatpush3.bf16.msra.mxu0 %v2683_v7  ;;  %2690 = vmatpush3.bf16.msra.mxu1 %v2683_v7  ;;  %v3164_v56 = vpack.c.bf16 %v35_v54, %v34_v53  ;;  %v3170_v58 = vpack.c.bf16 %v37_v57, %v36_v55  ;;  %v38_v59 = vld [vmem:[%s3666_s3 + $0x20] sm:$0xff]  ;;  %v40_v62 = vld [vmem:[%s3666_s3 + $0x30] sm:$0xff]  ;;  %v41_v63 = vld [vmem:[%s3666_s3 + $0x38] sm:$0xff] }
   0x9   :  { %2691 = vmatprep.subr.bf16.mxu0 %v2999_v0  ;;  %2703 = vmatprep.subr.bf16.mxu1 %v2999_v0  ;;  %v3180_v61 = vpack.c.bf16 %v39_v60, %v38_v59  ;;  %v3190_v1 = vpack.c.bf16 %v41_v63, %v40_v62 }
   0xb   :  { %2400 = vmatmul.mubr.msk.f32.vlgmr.msra.gmra.mrb[0].mxu0 %vm52_vm1, %v3066_v10  ;;  %2411 = vmatmul.mubr.msk.f32.vlgmr.msra.gmra.mrb[0].mxu1 %vm52_vm1, %v3073_v12 }
   0xc   :  { %2693 = vmatpush3.bf16.msra.mxu0 %v3068_v11  ;;  %2429 = vmatprep.mubr.msk.f32.mxu0 %vm3000_vm0, %v3001_v4 }
   0xd   :  { %2694 = vmatprep.subr.bf16.mxu0 %v2999_v0  ;;  %2448 = vmatprep.mubr.msk.f32.mxu1 %vm3000_vm0, %v3001_v4 }
   0xe   :  { %2705 = vmatpush3.bf16.msra.mxu1 %v3164_v56 }
   0xf   :  { %2706 = vmatprep.subr.bf16.mxu1 %v2999_v0 }
  0x10   :  { %2696 = vmatpush3.bf16.msra.mxu0 %v3088_v15 }
  0x11   :  { %2697 = vmatprep.subr.bf16.mxu0 %v2999_v0 }
  0x12   :  { %2708 = vmatpush3.bf16.msra.mxu1 %v3170_v58 }
  0x13   :  { %2709 = vmatprep.subr.bf16.mxu1 %v2999_v0 }
  0x14   :  { %2699 = vmatpush3.bf16.msra.mxu0 %v3102_v18 }
  0x15   :  { %2700 = vmatprep.subr.bf16.mxu0 %v2999_v0 }
  0x16   :  { %2711 = vmatpush3.bf16.msra.mxu1 %v3180_v61 }
  0x17   :  { %2712 = vmatprep.subr.bf16.mxu1 %v2999_v0 }
  0x18   :  { %2702 = vmatpush3.bf16.msra.mxu0 %v3112_v21 }
  0x19   :  { %2715 = vmatprep.subr.bf16.mxu0 %v2999_v0 }
  0x1a   :  { %2714 = vmatpush3.bf16.msra.mxu1 %v3190_v1 }
  0x1b   :  { %2430 = vmatmul.mubr.f32.vlgmr.msra.gmra.mrb[2].mxu0 %v3001_v4  ;;  %2727 = vmatprep.subr.bf16.mxu1 %v2999_v0 }
  0x1c   :  { %2717 = vmatpush3.bf16.msra.mxu0 %v3068_v11  ;;  %2467 = vmatprep.mubr.msk.f32.mxu0 %vm3000_vm0, %v3001_v4 }
  0x1d   :  { %2718 = vmatprep.subr.bf16.mxu0 %v2999_v0 }
  0x20   :  { %2720 = vmatpush3.bf16.msra.mxu0 %v3088_v15 }
  0x21   :  { %2721 = vmatprep.subr.bf16.mxu0 %v2999_v0 }
  0x24   :  { %2723 = vmatpush3.bf16.msra.mxu0 %v3102_v18 }
  0x25   :  { %2724 = vmatprep.subr.bf16.mxu0 %v2999_v0 }
  0x28   :  { %2726 = vmatpush3.bf16.msra.mxu0 %v3112_v21 }
  0x29   :  { %2739 = vmatprep.subr.bf16.mxu0 %v2999_v0 }
  0xde   :  { %v122_v22 = vpop.f32.mrb[0].mxu0  ;;  %v195_v23 = vpop.f32.mrb[0].mxu1 }
  0xdf   :  { %v2401_v24 = vpop.f32.mrb[1].mxu0  ;;  %v2412_v25 = vpop.f32.mrb[1].mxu1  ;;  %v3137_v39 = vadd.f32 %v2232_v36, %v122_v22  ;;  %v3141_v42 = vadd.f32 %v2232_v36, %v195_v23 }
  0xee   :  { %v269_v32 = vpop.f32.mrb[2].mxu0 }
  0xef   :  { %v280_v33 = vrot.slane %v269_v32, %v3128_v31  ;;  %v2431_v35 = vpop.f32.mrb[3].mxu0 }
  0xf1   :  { %v281_v37 = vcombine.high %v280_v33, %v280_v33  ;;  %v288_v38 = vrot.slane %v280_v33, %v3128_v31 }
  0xf3   :  { %v295_v40 = vrot.slane %v281_v37, %v3128_v31  ;;  %v299_v41 = vrot.slane %v288_v38, %v3131_v34 }
  0xf5   :  { %v303_v43 = vrot.slane %v295_v40, %v3131_v34  ;;  %v306_v44 = vadd.f32 %v299_v41, %v3137_v39 }
  0xf7   :  { %2879 = vtanh.f32 %v306_v44  ;;  %v307_v45 = vadd.f32 %v303_v43, %v3141_v42 }
  0xf9   :  { %2881 = vtanh.f32 %v307_v45 }
 0x101   :  { %v2880_v47 = vpop.eup %2879 }
 0x102   :  { %v314_v48 = vmul.f32 %v2880_v47, %v3149_v46 }
 0x103   :  { %v2882_v49 = vpop.eup %2881 }
 0x104   :  { %v317_v50 = vsel %vm316_vm2, %v314_v48, 0.0  ;;  %v315_v51 = vmul.f32 %v2882_v49, %v3149_v46 }
 0x105   :  { %318 = vadd.xlane.f32.xlu0 %v317_v50 }
 0x106   :  { %v320_v52 = vsel %vm316_vm2, %v315_v51, 0.0 }
 0x109   :  { %321 = vadd.xlane.f32.xlu0 %v320_v52 }
 0x192   :  { %v319_v2 = vpop.xlane.xlu0 %318 }
 0x193   :  { %v324_v3 = vsel %vm323_vm3, %v319_v2, -inf }
 0x194   :  { %v325_v5 = vrot.slane %v324_v3, 4 }
 0x196   :  { %v326_v6 = vmax.f32 %v324_v3, %v325_v5  ;;  %v322_v7 = vpop.xlane.xlu0 %321  ;;  %v3003_v3 = vmov 0  }
 0x197   :  { %v331_v8 = vsel %vm323_vm3, %v322_v7, -inf  ;;  %2872 = vset.pattern.permute.xlu1 %v3003_v3 }
 0x198   :  { %v327_v9 = vrot.slane %v326_v6, 2  ;;  %v332_v13 = vrot.slane %v331_v8, 4 }
 0x19a   :  { %v328_v14 = vmax.f32 %v326_v6, %v327_v9  ;;  %v333_v16 = vmax.f32 %v331_v8, %v332_v13 }
 0x19c   :  { %v329_v17 = vrot.slane %v328_v14, 1  ;;  %v334_v19 = vrot.slane %v333_v16, 2 }
 0x19e   :  { %v330_v20 = vmax.f32 %v328_v14, %v329_v17  ;;  %v335_v22 = vmax.f32 %v333_v16, %v334_v19  ;;  %v3208_v19 = vld [vmem:[%s3667_s1] sm:$0x3] }
 0x1a0   :  { %v338_v23 = vsub.f32 %v319_v2, %v330_v20  ;;  %v336_v24 = vrot.slane %v335_v22, 1 }
 0x1a2   :  { %v340_v25 = vmul.f32 1.442695, %v338_v23  ;;  %v337_v26 = vmax.f32 %v335_v22, %v336_v24  ;;  %v3226_v23 = vld [vmem:[%s3666_s3 + $0x40] ss:$0 sm:$0xff] }
 0x1a4   :  { %2883 = vpow2.f32 %v340_v25  ;;  %v339_v27 = vsub.f32 %v322_v7, %v337_v26  ;;  %v3232_v26 = vld [vmem:[%s3666_s3 + $0x41] ss:$0 sm:$0xff] }
 0x1a6   :  { %v342_v28 = vmul.f32 1.442695, %v339_v27 }
 0x1a8   :  { %2885 = vpow2.f32 %v342_v28 }
 0x1ae   :  { %v2884_v29 = vpop.eup %2883 }
 0x1af   :  { %v344_v30 = vmul.f32 %v2884_v29, %v3066_v10  ;;  %v360_v32 = vsel %vm323_vm3, %v2884_v29, 0.0 }
 0x1b0   :  { %v361_v33 = vrot.slane %v360_v32, 4 }
 0x1b1   :  { %v346_v37 = vsel %vm316_vm2, %v344_v30, 0.0  ;;  %v3237_v30 = vld [vmem:[%s3666_s3 + $0x42] ss:$0 sm:$0xff] }
 0x1b2   :  { %v2886_v35 = vpop.eup %2885  ;;  %v362_v36 = vadd.f32 %v361_v33, %v360_v32  ;;  %v347_v44 = vrot.slane %v346_v37, 4 }
 0x1b3   :  { %v345_v38 = vmul.f32 %v2886_v35, %v3073_v12  ;;  %v367_v40 = vsel %vm323_vm3, %v2886_v35, 0.0 }
 0x1b4   :  { %v363_v41 = vrot.slane %v362_v36, 2  ;;  %v368_v43 = vrot.slane %v367_v40, 4  ;;  %v348_v52 = vadd.f32 %v347_v44, %v346_v37 }
 0x1b5   :  { %v353_v45 = vsel %vm316_vm2, %v345_v38, 0.0 }
 0x1b6   :  { %v364_v47 = vadd.f32 %v363_v41, %v362_v36  ;;  %v369_v48 = vadd.f32 %v368_v43, %v367_v40  ;;  %v354_v49 = vrot.slane %v353_v45, 4  ;;  %v349_v59 = vrot.slane %v348_v52, 2  ;;  %v3244_v36 = vld [vmem:[%s3666_s3 + $0x43] ss:$0 sm:$0xff] }
 0x1b8   :  { %v370_v50 = vrot.slane %v369_v48, 2  ;;  %v365_v51 = vrot.slane %v364_v47, 1  ;;  %v355_v53 = vadd.f32 %v354_v49, %v353_v45  ;;  %v350_v63 = vadd.f32 %v349_v59, %v348_v52 }
 0x1ba   :  { %v371_v54 = vadd.f32 %v370_v50, %v369_v48  ;;  %v366_v55 = vadd.f32 %v365_v51, %v364_v47  ;;  %v356_v60 = vrot.slane %v355_v53, 2  ;;  %v351_v5 = vrot.slane %v350_v63, 1 }
 0x1bc   :  { %v372_v57 = vrot.slane %v371_v54, 1  ;;  %2887 = vrcp.f32 %v366_v55  ;;  %v357_v2 = vadd.f32 %v356_v60, %v355_v53  ;;  %v352_v8 = vadd.f32 %v351_v5, %v350_v63 }
 0x1be   :  { %v373_v62 = vadd.f32 %v372_v57, %v371_v54  ;;  %v358_v6 = vrot.slane %v357_v2, 1 }
 0x1c0   :  { %2889 = vrcp.f32 %v373_v62  ;;  %v359_v9 = vadd.f32 %v358_v6, %v357_v2 }
 0x1c6   :  { %v2888_v7 = vpop.eup %2887 }
 0x1c7   :  { %v376_v14 = vmul.f32 %v2888_v7, %v352_v8 }
 0x1ca   :  { %v2890_v13 = vpop.eup %2889 }
 0x1cb   :  { %v377_v16 = vmul.f32 %v2890_v13, %v359_v9 }
 0x1cd   :  { %v381_v17 = vsel %vm380_vm4, %v377_v16, %v376_v14 }
 0x1ce   :  { %382 = vrot.lane.b32.xlu1 %v381_v17, %s3004_s11 }
 0x1d2   :  { %388 = vperm.xlu1 %2872, %v3208_v19  }
 0x240   :  { %v383_v20 = vpop.permute.xlu1 %382 }
 0x241   :  { %v385_v22 = vsel %vm52_vm1, 0.0, %v383_v20 }
 0x242   :  { %2449 = vmatmul.mubr.msk.f32.vlgmr.msra.gmra.mrb[2].mxu1 %vm199_vm5, %v385_v22 }
 0x243   :  { %2729 = vmatpush3.bf16.msra.mxu1 %v3164_v56  ;;  %2486 = vmatprep.mubr.msk.f32.mxu1 %vm3000_vm0, %v3001_v4 }
 0x244   :  { %2730 = vmatprep.subr.bf16.mxu1 %v2999_v0 }
 0x247   :  { %2732 = vmatpush3.bf16.msra.mxu1 %v3170_v58 }
 0x248   :  { %2733 = vmatprep.subr.bf16.mxu1 %v2999_v0 }
 0x24b   :  { %2735 = vmatpush3.bf16.msra.mxu1 %v3180_v61 }
 0x24c   :  { %2736 = vmatprep.subr.bf16.mxu1 %v2999_v0 }
 0x24f   :  { %2738 = vmatpush3.bf16.msra.mxu1 %v3190_v1 }
 0x250   :  { %2751 = vmatprep.subr.bf16.mxu1 %v2999_v0 }
 0x251   :  { %v389_v24 = vpop.permute.xlu1 %388 }
 0x252   :  { %v395_v25 = vmul.f32 %v3226_v23, %v389_v24 }
 0x315   :  { %v465_v27 = vpop.f32.mrb[2].mxu1 }
 0x316   :  { %v466_v28 = vadd.f32 %v465_v27, %v395_v25  ;;  %v2450_v29 = vpop.f32.mrb[3].mxu1 }
 0x318   :  { %v473_v32 = vadd.f32 %v3232_v26, %v466_v28 }
 0x31a   :  { %v478_v33 = vmul.f32 %v3237_v30, %v473_v32 }
 0x31c   :  { %2891 = vtanh.f32 %v478_v33 }
 0x326   :  { %v2892_v35 = vpop.eup %2891 }
 0x327   :  { %v480_v37 = vmul.f32 %v2892_v35, %v3237_v30 }
 0x329   :  { %v485_v38 = vadd.f32 %v3244_v36, %v480_v37 }
 0x32b   :  { %488 = vrot.lane.b32.xlu0 %v485_v38, %s3005_s22  ;;  %v486_v43 = vmul.f32 0.0, %v485_v38 }
 0x39d   :  { %v489_v40 = vpop.permute.xlu0 %488 }
 0x39e   :  { %v491_v41 = vmul.f32 %v489_v40, %v485_v38 }
 0x3a0   :  { %493 = vrot.lane.b32.xlu1 %v491_v41, %s3004_s11 }
 0x412   :  { %v494_v44 = vpop.permute.xlu1 %493 }
 0x413   :  { %v3250_v45 = vadd.f32 %v494_v44, %v486_v43 }
 0x415   :  { %2893 = vtanh.f32 %v3250_v45 }
 0x41f   :  { %v2894_v47 = vpop.eup %2893 }
 0x420   :  { %499 = vrot.lane.b32.xlu1 %v2894_v47, %s3005_s22 }
 0x492   :  { %v500_v48 = vpop.permute.xlu1 %499 }
 0x493   :  { %v502_v49 = vmul.f32 %v500_v48, %v485_v38 }
 0x495   :  { %504 = vrot.lane.b32.xlu1 %v502_v49, %s3004_s11 }
 0x507   :  { %v3255_v50 = vpop.permute.xlu1 %504 }
 0x508   :  { %v507_v51 = vsel %vm52_vm1, %v3255_v50, %v3250_v45 }
 0x509   :  { %2468 = vmatmul.mubr.msk.f32.vlgmr.msra.gmra.mrb[4].mxu0 %vm199_vm5, %v507_v51 }
 0x50a   :  { %2741 = vmatpush3.bf16.msra.mxu0 %v3068_v11  ;;  %2505 = vmatprep.mubr.msk.f32.mxu0 %vm3000_vm0, %v3001_v4 }
 0x50b   :  { %2742 = vmatprep.subr.bf16.mxu0 %v2999_v0 }
 0x50e   :  { %2744 = vmatpush3.bf16.msra.mxu0 %v3088_v15 }
 0x50f   :  { %2745 = vmatprep.subr.bf16.mxu0 %v2999_v0 }
 0x512   :  { %2747 = vmatpush3.bf16.msra.mxu0 %v3102_v18 }
 0x513   :  { %2748 = vmatprep.subr.bf16.mxu0 %v2999_v0 }
 0x516   :  { %2750 = vmatpush3.bf16.msra.mxu0 %v3112_v21 }
 0x517   :  { %2763 = vmatprep.subr.bf16.mxu0 %v2999_v0 }
 0x5dc   :  { %v577_v52 = vpop.f32.mrb[4].mxu0 }
 0x5dd   :  { %v588_v53 = vrot.slane %v577_v52, %v3128_v31  ;;  %v2469_v54 = vpop.f32.mrb[5].mxu0 }
 0x5df   :  { %v589_v55 = vcombine.high %v588_v53, %v588_v53  ;;  %v596_v57 = vrot.slane %v588_v53, %v3128_v31 }
 0x5e1   :  { %v603_v59 = vrot.slane %v589_v55, %v3128_v31  ;;  %v607_v60 = vrot.slane %v596_v57, %v3131_v34 }
 0x5e3   :  { %v611_v62 = vrot.slane %v603_v59, %v3131_v34  ;;  %v614_v63 = vadd.f32 %v607_v60, %v3137_v39 }
 0x5e5   :  { %v615_v2 = vadd.f32 %v611_v62, %v3141_v42  ;;  %2895 = vtanh.f32 %v614_v63 }
 0x5e7   :  { %2897 = vtanh.f32 %v615_v2 }
 0x5ef   :  { %v2896_v3 = vpop.eup %2895 }
 0x5f0   :  { %v618_v5 = vmul.f32 %v2896_v3, %v3149_v46 }
 0x5f1   :  { %v2898_v6 = vpop.eup %2897 }
 0x5f2   :  { %v620_v7 = vsel %vm316_vm2, %v618_v5, 0.0  ;;  %v619_v8 = vmul.f32 %v2898_v6, %v3149_v46 }
 0x5f3   :  { %621 = vadd.xlane.f32.xlu1 %v620_v7 }
 0x5f4   :  { %v623_v9 = vsel %vm316_vm2, %v619_v8, 0.0 }
 0x5f5   :  { %624 = vadd.xlane.f32.xlu0 %v623_v9 }
 0x680   :  { %v622_v13 = vpop.xlane.xlu1 %621 }
 0x681   :  { %v626_v14 = vsel %vm323_vm3, %v622_v13, -inf }
 0x682   :  { %v627_v16 = vrot.slane %v626_v14, 4  ;;  %v625_v17 = vpop.xlane.xlu0 %624 }
 0x683   :  { %v633_v20 = vsel %vm323_vm3, %v625_v17, -inf }
 0x684   :  { %v628_v22 = vmax.f32 %v626_v14, %v627_v16  ;;  %v634_v24 = vrot.slane %v633_v20, 4 }
 0x686   :  { %v629_v25 = vrot.slane %v628_v22, 2  ;;  %v635_v27 = vmax.f32 %v633_v20, %v634_v24 }
 0x688   :  { %v630_v28 = vmax.f32 %v628_v22, %v629_v25  ;;  %v636_v29 = vrot.slane %v635_v27, 2 }
 0x68a   :  { %v631_v32 = vrot.slane %v630_v28, 1  ;;  %v637_v33 = vmax.f32 %v635_v27, %v636_v29  ;;  %v3006_v27 = vmov 1  }
 0x68b   :  { %2873 = vset.pattern.permute.xlu0 %v3006_v27 }
 0x68c   :  { %v632_v35 = vmax.f32 %v630_v28, %v631_v32  ;;  %v638_v37 = vrot.slane %v637_v33, 1  ;;  %688 = vperm.xlu0 %2873, %v3208_v19  }
 0x68e   :  { %v640_v38 = vsub.f32 %v622_v13, %v632_v35  ;;  %v639_v40 = vmax.f32 %v637_v33, %v638_v37 }
 0x690   :  { %v642_v41 = vmul.f32 1.442695, %v640_v38  ;;  %v641_v43 = vsub.f32 %v625_v17, %v639_v40 }
 0x692   :  { %2899 = vpow2.f32 %v642_v41  ;;  %v644_v44 = vmul.f32 1.442695, %v641_v43 }
 0x694   :  { %2901 = vpow2.f32 %v644_v44 }
 0x69c   :  { %v2900_v47 = vpop.eup %2899 }
 0x69d   :  { %v646_v48 = vmul.f32 %v2900_v47, %v3066_v10  ;;  %v662_v49 = vsel %vm323_vm3, %v2900_v47, 0.0 }
 0x69e   :  { %v2902_v51 = vpop.eup %2901  ;;  %v663_v52 = vrot.slane %v662_v49, 4 }
 0x69f   :  { %v647_v53 = vmul.f32 %v2902_v51, %v3073_v12  ;;  %v669_v54 = vsel %vm323_vm3, %v2902_v51, 0.0  ;;  %v648_v55 = vsel %vm316_vm2, %v646_v48, 0.0 }
 0x6a0   :  { %v664_v57 = vadd.f32 %v663_v52, %v662_v49  ;;  %v670_v59 = vrot.slane %v669_v54, 4  ;;  %v649_v60 = vrot.slane %v648_v55, 4 }
 0x6a1   :  { %v655_v62 = vsel %vm316_vm2, %v647_v53, 0.0 }
 0x6a2   :  { %v665_v63 = vrot.slane %v664_v57, 2  ;;  %v671_v2 = vadd.f32 %v670_v59, %v669_v54  ;;  %v656_v3 = vrot.slane %v655_v62, 4  ;;  %v650_v7 = vadd.f32 %v649_v60, %v648_v55 }
 0x6a4   :  { %v666_v5 = vadd.f32 %v665_v63, %v664_v57  ;;  %v672_v6 = vrot.slane %v671_v2, 2  ;;  %v657_v8 = vadd.f32 %v656_v3, %v655_v62  ;;  %v651_v17 = vrot.slane %v650_v7, 2 }
 0x6a6   :  { %v667_v9 = vrot.slane %v666_v5, 1  ;;  %v673_v13 = vadd.f32 %v672_v6, %v671_v2  ;;  %v658_v20 = vrot.slane %v657_v8, 2  ;;  %v652_v24 = vadd.f32 %v651_v17, %v650_v7 }
 0x6a8   :  { %v674_v14 = vrot.slane %v673_v13, 1  ;;  %v668_v16 = vadd.f32 %v667_v9, %v666_v5  ;;  %v659_v25 = vadd.f32 %v658_v20, %v657_v8  ;;  %v653_v28 = vrot.slane %v652_v24, 1 }
 0x6aa   :  { %v675_v22 = vadd.f32 %v674_v14, %v673_v13  ;;  %2903 = vrcp.f32 %v668_v16  ;;  %v660_v29 = vrot.slane %v659_v25, 1  ;;  %v654_v33 = vadd.f32 %v653_v28, %v652_v24 }
 0x6ac   :  { %2905 = vrcp.f32 %v675_v22  ;;  %v661_v35 = vadd.f32 %v660_v29, %v659_v25 }
 0x6b4   :  { %v2904_v32 = vpop.eup %2903 }
 0x6b5   :  { %v678_v38 = vmul.f32 %v2904_v32, %v654_v33 }
 0x6b6   :  { %v2906_v37 = vpop.eup %2905 }
 0x6b7   :  { %v679_v40 = vmul.f32 %v2906_v37, %v661_v35 }
 0x6b9   :  { %v682_v41 = vsel %vm380_vm4, %v679_v40, %v678_v38 }
 0x6ba   :  { %683 = vrot.lane.b32.xlu1 %v682_v41, %s3004_s11 }
 0x72c   :  { %v684_v43 = vpop.permute.xlu1 %683 }
 0x72d   :  { %v686_v44 = vsel %vm52_vm1, %v3255_v50, %v684_v43  ;;  %v689_v50 = vpop.permute.xlu0 %688 }
 0x72e   :  { %2487 = vmatmul.mubr.msk.f32.vlgmr.msra.gmra.mrb[4].mxu1 %vm199_vm5, %v686_v44  ;;  %v691_v47 = vmul.f32 %v3226_v23, %v689_v50 }
 0x72f   :  { %2753 = vmatpush3.bf16.msra.mxu1 %v3164_v56  ;;  %2524 = vmatprep.mubr.msk.f32.mxu1 %vm3000_vm0, %v3001_v4 }
 0x730   :  { %2754 = vmatprep.subr.bf16.mxu1 %v2999_v0 }
 0x733   :  { %2756 = vmatpush3.bf16.msra.mxu1 %v3170_v58 }
 0x734   :  { %2757 = vmatprep.subr.bf16.mxu1 %v2999_v0 }
 0x737   :  { %2759 = vmatpush3.bf16.msra.mxu1 %v3180_v61 }
 0x738   :  { %2760 = vmatprep.subr.bf16.mxu1 %v2999_v0 }
 0x73b   :  { %2762 = vmatpush3.bf16.msra.mxu1 %v3190_v1 }
 0x73c   :  { %2775 = vmatprep.subr.bf16.mxu1 %v2999_v0 }
 0x801   :  { %v761_v48 = vpop.f32.mrb[4].mxu1 }
 0x802   :  { %v762_v49 = vadd.f32 %v761_v48, %v691_v47  ;;  %v2488_v51 = vpop.f32.mrb[5].mxu1 }
 0x804   :  { %v765_v52 = vadd.f32 %v3232_v26, %v762_v49 }
 0x806   :  { %v766_v53 = vmul.f32 %v3237_v30, %v765_v52 }
 0x808   :  { %2907 = vtanh.f32 %v766_v53 }
 0x812   :  { %v2908_v54 = vpop.eup %2907 }
 0x813   :  { %v768_v55 = vmul.f32 %v2908_v54, %v3237_v30 }
 0x815   :  { %v769_v57 = vadd.f32 %v3244_v36, %v768_v55 }
 0x817   :  { %772 = vrot.lane.b32.xlu1 %v769_v57, %s3005_s22  ;;  %v770_v62 = vmul.f32 %v769_v57, %v3250_v45 }
 0x889   :  { %v773_v59 = vpop.permute.xlu1 %772 }
 0x88a   :  { %v775_v60 = vmul.f32 %v773_v59, %v769_v57 }
 0x88c   :  { %777 = vrot.lane.b32.xlu1 %v775_v60, %s3004_s11 }
 0x8fe   :  { %v778_v63 = vpop.permute.xlu1 %777 }
 0x8ff   :  { %v3314_v2 = vadd.f32 %v778_v63, %v770_v62 }
 0x901   :  { %2909 = vtanh.f32 %v3314_v2 }
 0x90b   :  { %v2910_v3 = vpop.eup %2909 }
 0x90c   :  { %783 = vrot.lane.b32.xlu1 %v2910_v3, %s3005_s22 }
 0x97e   :  { %v784_v5 = vpop.permute.xlu1 %783 }
 0x97f   :  { %v786_v6 = vmul.f32 %v784_v5, %v769_v57 }
 0x981   :  { %788 = vrot.lane.b32.xlu1 %v786_v6, %s3004_s11 }
 0x9f3   :  { %v3319_v7 = vpop.permute.xlu1 %788 }
 0x9f4   :  { %v791_v8 = vsel %vm52_vm1, %v3319_v7, %v3314_v2 }
 0x9f5   :  { %2506 = vmatmul.mubr.msk.f32.vlgmr.msra.gmra.mrb[6].mxu0 %vm199_vm5, %v791_v8 }
 0x9f6   :  { %2765 = vmatpush3.bf16.msra.mxu0 %v3068_v11  ;;  %2543 = vmatprep.mubr.msk.f32.mxu0 %vm3000_vm0, %v3001_v4 }
 0x9f7   :  { %2766 = vmatprep.subr.bf16.mxu0 %v2999_v0 }
 0x9fa   :  { %2768 = vmatpush3.bf16.msra.mxu0 %v3088_v15 }
 0x9fb   :  { %2769 = vmatprep.subr.bf16.mxu0 %v2999_v0 }
 0x9fe   :  { %2771 = vmatpush3.bf16.msra.mxu0 %v3102_v18 }
 0x9ff   :  { %2772 = vmatprep.subr.bf16.mxu0 %v2999_v0 }
 0xa02   :  { %2774 = vmatpush3.bf16.msra.mxu0 %v3112_v21 }
 0xa03   :  { %2787 = vmatprep.subr.bf16.mxu0 %v2999_v0 }
 0xac8   :  { %v861_v45 = vpop.f32.mrb[6].mxu0 }
 0xac9   :  { %v872_v9 = vrot.slane %v861_v45, %v3128_v31  ;;  %v2507_v13 = vpop.f32.mrb[7].mxu0 }
 0xacb   :  { %v873_v14 = vcombine.high %v872_v9, %v872_v9  ;;  %v880_v16 = vrot.slane %v872_v9, %v3128_v31 }
 0xacd   :  { %v887_v17 = vrot.slane %v873_v14, %v3128_v31  ;;  %v891_v20 = vrot.slane %v880_v16, %v3131_v34 }
 0xacf   :  { %v895_v22 = vrot.slane %v887_v17, %v3131_v34  ;;  %v898_v24 = vadd.f32 %v891_v20, %v3137_v39 }
 0xad1   :  { %v899_v25 = vadd.f32 %v895_v22, %v3141_v42  ;;  %2911 = vtanh.f32 %v898_v24 }
 0xad3   :  { %2913 = vtanh.f32 %v899_v25 }
 0xadb   :  { %v2912_v27 = vpop.eup %2911 }
 0xadc   :  { %v902_v28 = vmul.f32 %v2912_v27, %v3149_v46 }
 0xadd   :  { %v2914_v29 = vpop.eup %2913 }
 0xade   :  { %v904_v32 = vsel %vm316_vm2, %v902_v28, 0.0  ;;  %v903_v33 = vmul.f32 %v2914_v29, %v3149_v46 }
 0xadf   :  { %905 = vadd.xlane.f32.xlu1 %v904_v32 }
 0xae0   :  { %v907_v35 = vsel %vm316_vm2, %v903_v33, 0.0 }
 0xae1   :  { %908 = vadd.xlane.f32.xlu0 %v907_v35 }
 0xb6c   :  { %v906_v37 = vpop.xlane.xlu1 %905 }
 0xb6d   :  { %v910_v38 = vsel %vm323_vm3, %v906_v37, -inf }
 0xb6e   :  { %v911_v40 = vrot.slane %v910_v38, 4  ;;  %v909_v41 = vpop.xlane.xlu0 %908 }
 0xb6f   :  { %v917_v43 = vsel %vm323_vm3, %v909_v41, -inf }
 0xb70   :  { %v912_v44 = vmax.f32 %v910_v38, %v911_v40  ;;  %v918_v50 = vrot.slane %v917_v43, 4 }
 0xb72   :  { %v913_v47 = vrot.slane %v912_v44, 2  ;;  %v919_v48 = vmax.f32 %v917_v43, %v918_v50  ;;  %v3007_v50 = vmov 2  }
 0xb73   :  { %2874 = vset.pattern.permute.xlu0 %v3007_v50 }
 0xb74   :  { %v914_v49 = vmax.f32 %v912_v44, %v913_v47  ;;  %v920_v51 = vrot.slane %v919_v48, 2  ;;  %972 = vperm.xlu0 %2874, %v3208_v19  }
 0xb76   :  { %v915_v52 = vrot.slane %v914_v49, 1  ;;  %v921_v53 = vmax.f32 %v919_v48, %v920_v51 }
 0xb78   :  { %v916_v54 = vmax.f32 %v914_v49, %v915_v52  ;;  %v922_v55 = vrot.slane %v921_v53, 1 }
 0xb7a   :  { %v924_v57 = vsub.f32 %v906_v37, %v916_v54  ;;  %v923_v59 = vmax.f32 %v921_v53, %v922_v55 }
 0xb7c   :  { %v926_v60 = vmul.f32 1.442695, %v924_v57  ;;  %v925_v62 = vsub.f32 %v909_v41, %v923_v59 }
 0xb7e   :  { %2915 = vpow2.f32 %v926_v60  ;;  %v928_v63 = vmul.f32 1.442695, %v925_v62 }
 0xb80   :  { %2917 = vpow2.f32 %v928_v63 }
 0xb88   :  { %v2916_v3 = vpop.eup %2915 }
 0xb89   :  { %v930_v5 = vmul.f32 %v2916_v3, %v3066_v10  ;;  %v946_v6 = vsel %vm323_vm3, %v2916_v3, 0.0 }
 0xb8a   :  { %v2918_v8 = vpop.eup %2917  ;;  %v947_v45 = vrot.slane %v946_v6, 4 }
 0xb8b   :  { %v931_v9 = vmul.f32 %v2918_v8, %v3073_v12  ;;  %v953_v13 = vsel %vm323_vm3, %v2918_v8, 0.0  ;;  %v932_v14 = vsel %vm316_vm2, %v930_v5, 0.0 }
 0xb8c   :  { %v948_v16 = vadd.f32 %v947_v45, %v946_v6  ;;  %v954_v17 = vrot.slane %v953_v13, 4  ;;  %v933_v20 = vrot.slane %v932_v14, 4 }
 0xb8d   :  { %v939_v22 = vsel %vm316_vm2, %v931_v9, 0.0 }
 0xb8e   :  { %v949_v24 = vrot.slane %v948_v16, 2  ;;  %v955_v25 = vadd.f32 %v954_v17, %v953_v13  ;;  %v940_v27 = vrot.slane %v939_v22, 4  ;;  %v934_v29 = vadd.f32 %v933_v20, %v932_v14 }
 0xb90   :  { %v950_v28 = vadd.f32 %v949_v24, %v948_v16  ;;  %v956_v10 = vrot.slane %v955_v25, 2  ;;  %v941_v32 = vadd.f32 %v940_v27, %v939_v22  ;;  %v935_v38 = vrot.slane %v934_v29, 2 }
 0xb92   :  { %v951_v33 = vrot.slane %v950_v28, 1  ;;  %v957_v35 = vadd.f32 %v956_v10, %v955_v25  ;;  %v942_v40 = vrot.slane %v941_v32, 2  ;;  %v936_v43 = vadd.f32 %v935_v38, %v934_v29 }
 0xb94   :  { %v958_v37 = vrot.slane %v957_v35, 1  ;;  %v952_v12 = vadd.f32 %v951_v33, %v950_v28  ;;  %v943_v44 = vadd.f32 %v942_v40, %v941_v32  ;;  %v937_v47 = vrot.slane %v936_v43, 1 }
 0xb96   :  { %v959_v41 = vadd.f32 %v958_v37, %v957_v35  ;;  %2919 = vrcp.f32 %v952_v12  ;;  %v944_v48 = vrot.slane %v943_v44, 1  ;;  %v938_v51 = vadd.f32 %v937_v47, %v936_v43 }
 0xb98   :  { %2921 = vrcp.f32 %v959_v41  ;;  %v945_v52 = vadd.f32 %v944_v48, %v943_v44 }
 0xba0   :  { %v2920_v49 = vpop.eup %2919 }
 0xba1   :  { %v962_v54 = vmul.f32 %v2920_v49, %v938_v51 }
 0xba2   :  { %v2922_v53 = vpop.eup %2921 }
 0xba3   :  { %v963_v55 = vmul.f32 %v2922_v53, %v945_v52 }
 0xba5   :  { %v966_v57 = vsel %vm380_vm4, %v963_v55, %v962_v54 }
 0xba6   :  { %967 = vrot.lane.b32.xlu1 %v966_v57, %s3004_s11 }
 0xc18   :  { %v968_v59 = vpop.permute.xlu1 %967 }
 0xc19   :  { %v970_v60 = vsel %vm52_vm1, %v3319_v7, %v968_v59  ;;  %v973_v7 = vpop.permute.xlu0 %972 }
 0xc1a   :  { %2525 = vmatmul.mubr.msk.f32.vlgmr.msra.gmra.mrb[6].mxu1 %vm199_vm5, %v970_v60  ;;  %v975_v62 = vmul.f32 %v3226_v23, %v973_v7 }
 0xc1b   :  { %2777 = vmatpush3.bf16.msra.mxu1 %v3164_v56  ;;  %2562 = vmatprep.mubr.msk.f32.mxu1 %vm3000_vm0, %v3001_v4 }
 0xc1c   :  { %2778 = vmatprep.subr.bf16.mxu1 %v2999_v0 }
 0xc1f   :  { %2780 = vmatpush3.bf16.msra.mxu1 %v3170_v58 }
 0xc20   :  { %2781 = vmatprep.subr.bf16.mxu1 %v2999_v0 }
 0xc23   :  { %2783 = vmatpush3.bf16.msra.mxu1 %v3180_v61 }
 0xc24   :  { %2784 = vmatprep.subr.bf16.mxu1 %v2999_v0 }
 0xc27   :  { %2786 = vmatpush3.bf16.msra.mxu1 %v3190_v1 }
 0xc28   :  { %2799 = vmatprep.subr.bf16.mxu1 %v2999_v0 }
 0xced   :  { %v1045_v63 = vpop.f32.mrb[6].mxu1 }
 0xcee   :  { %v1046_v3 = vadd.f32 %v1045_v63, %v975_v62  ;;  %v2526_v5 = vpop.f32.mrb[7].mxu1 }
 0xcf0   :  { %v1049_v6 = vadd.f32 %v3232_v26, %v1046_v3 }
 0xcf2   :  { %v1050_v8 = vmul.f32 %v3237_v30, %v1049_v6 }
 0xcf4   :  { %2923 = vtanh.f32 %v1050_v8 }
 0xcfe   :  { %v2924_v45 = vpop.eup %2923 }
 0xcff   :  { %v1052_v9 = vmul.f32 %v2924_v45, %v3237_v30 }
 0xd01   :  { %v1053_v13 = vadd.f32 %v3244_v36, %v1052_v9 }
 0xd03   :  { %1056 = vrot.lane.b32.xlu1 %v1053_v13, %s3005_s22  ;;  %v1054_v17 = vmul.f32 %v1053_v13, %v3314_v2 }
 0xd75   :  { %v1057_v14 = vpop.permute.xlu1 %1056 }
 0xd76   :  { %v1059_v16 = vmul.f32 %v1057_v14, %v1053_v13 }
 0xd78   :  { %1061 = vrot.lane.b32.xlu1 %v1059_v16, %s3004_s11 }
 0xdea   :  { %v1062_v20 = vpop.permute.xlu1 %1061 }
 0xdeb   :  { %v3378_v22 = vadd.f32 %v1062_v20, %v1054_v17  ;;  %v3415_v17 = vld [vmem:[%s3665_s0] sm:$0x7f] }
 0xded   :  { %2925 = vtanh.f32 %v3378_v22 }
 0xdf7   :  { %v2926_v24 = vpop.eup %2925 }
 0xdf8   :  { %1067 = vrot.lane.b32.xlu1 %v2926_v24, %s3005_s22 }
 0xe6a   :  { %v1068_v25 = vpop.permute.xlu1 %1067 }
 0xe6b   :  { %v1070_v27 = vmul.f32 %v1068_v25, %v1053_v13 }
 0xe6d   :  { %1072 = vrot.lane.b32.xlu1 %v1070_v27, %s3004_s11 }
 0xedf   :  { %v3383_v28 = vpop.permute.xlu1 %1072 }
 0xee0   :  { %v1075_v10 = vsel %vm52_vm1, %v3383_v28, %v3378_v22 }
 0xee1   :  { %2544 = vmatmul.mubr.msk.f32.vlgmr.msra.gmra.mrb[8].mxu0 %vm199_vm5, %v1075_v10  ;;  %v3422_v10 = vld [vmem:[%s3665_s0 + $0x8] sm:$0x7f] }
 0xee2   :  { %2789 = vmatpush3.bf16.msra.mxu0 %v3068_v11  ;;  %2581 = vmatprep.mubr.msk.f32.mxu0 %vm3000_vm0, %v3001_v4 }
 0xee3   :  { %2790 = vmatprep.subr.bf16.mxu0 %v2999_v0 }
 0xee6   :  { %2792 = vmatpush3.bf16.msra.mxu0 %v3088_v15 }
 0xee7   :  { %2793 = vmatprep.subr.bf16.mxu0 %v2999_v0 }
 0xeea   :  { %2795 = vmatpush3.bf16.msra.mxu0 %v3102_v18 }
 0xeeb   :  { %2796 = vmatprep.subr.bf16.mxu0 %v2999_v0 }
 0xeee   :  { %2798 = vmatpush3.bf16.msra.mxu0 %v3112_v21 }
 0xeef   :  { %2811 = vmatprep.subr.bf16.mxu0 %v2999_v0 }
 0xfb4   :  { %v1145_v2 = vpop.f32.mrb[8].mxu0 }
 0xfb5   :  { %v1156_v29 = vrot.slane %v1145_v2, %v3128_v31  ;;  %v2545_v32 = vpop.f32.mrb[9].mxu0 }
 0xfb7   :  { %v1157_v33 = vcombine.high %v1156_v29, %v1156_v29  ;;  %v1164_v35 = vrot.slane %v1156_v29, %v3128_v31 }
 0xfb9   :  { %v1171_v37 = vrot.slane %v1157_v33, %v3128_v31  ;;  %v1175_v12 = vrot.slane %v1164_v35, %v3131_v34 }
 0xfbb   :  { %v1179_v38 = vrot.slane %v1171_v37, %v3131_v34  ;;  %v1182_v40 = vadd.f32 %v1175_v12, %v3137_v39 }
 0xfbd   :  { %v1183_v41 = vadd.f32 %v1179_v38, %v3141_v42  ;;  %2927 = vtanh.f32 %v1182_v40 }
 0xfbf   :  { %2929 = vtanh.f32 %v1183_v41 }
 0xfc7   :  { %v2928_v43 = vpop.eup %2927 }
 0xfc8   :  { %v1186_v44 = vmul.f32 %v2928_v43, %v3149_v46 }
 0xfc9   :  { %v2930_v50 = vpop.eup %2929 }
 0xfca   :  { %v1188_v47 = vsel %vm316_vm2, %v1186_v44, 0.0  ;;  %v1187_v48 = vmul.f32 %v2930_v50, %v3149_v46 }
 0xfcb   :  { %1189 = vadd.xlane.f32.xlu1 %v1188_v47 }
 0xfcc   :  { %v1191_v49 = vsel %vm316_vm2, %v1187_v48, 0.0 }
 0xfcd   :  { %1192 = vadd.xlane.f32.xlu0 %v1191_v49 }
0x1058   :  { %v1190_v51 = vpop.xlane.xlu1 %1189 }
0x1059   :  { %v1194_v52 = vsel %vm323_vm3, %v1190_v51, -inf }
0x105a   :  { %v1195_v53 = vrot.slane %v1194_v52, 4  ;;  %v1193_v54 = vpop.xlane.xlu0 %1192 }
0x105b   :  { %v1201_v55 = vsel %vm323_vm3, %v1193_v54, -inf }
0x105c   :  { %v1196_v57 = vmax.f32 %v1194_v52, %v1195_v53  ;;  %v1202_v59 = vrot.slane %v1201_v55, 4 }
0x105e   :  { %v1197_v60 = vrot.slane %v1196_v57, 2  ;;  %v1203_v7 = vmax.f32 %v1201_v55, %v1202_v59 }
0x1060   :  { %v1198_v62 = vmax.f32 %v1196_v57, %v1197_v60  ;;  %v1204_v63 = vrot.slane %v1203_v7, 2  ;;  %v3008_v60 = vmov 3  }
0x1061   :  { %2875 = vset.pattern.permute.xlu0 %v3008_v60 }
0x1062   :  { %v1199_v3 = vrot.slane %v1198_v62, 1  ;;  %v1205_v5 = vmax.f32 %v1203_v7, %v1204_v63  ;;  %1256 = vperm.xlu0 %2875, %v3208_v19  }
0x1064   :  { %v1200_v46 = vmax.f32 %v1198_v62, %v1199_v3  ;;  %v1206_v6 = vrot.slane %v1205_v5, 1 }
0x1066   :  { %v1208_v8 = vsub.f32 %v1190_v51, %v1200_v46  ;;  %v1207_v45 = vmax.f32 %v1205_v5, %v1206_v6 }
0x1068   :  { %v1210_v9 = vmul.f32 1.442695, %v1208_v8  ;;  %v1209_v13 = vsub.f32 %v1193_v54, %v1207_v45 }
0x106a   :  { %2931 = vpow2.f32 %v1210_v9  ;;  %v1212_v14 = vmul.f32 1.442695, %v1209_v13 }
0x106c   :  { %2933 = vpow2.f32 %v1212_v14 }
0x1074   :  { %v2932_v16 = vpop.eup %2931 }
0x1075   :  { %v1214_v20 = vmul.f32 %v3415_v17, %v2932_v16  ;;  %v1230_v24 = vsel %vm323_vm3, %v2932_v16, 0.0 }
0x1076   :  { %v2934_v25 = vpop.eup %2933  ;;  %v1231_v27 = vrot.slane %v1230_v24, 4 }
0x1077   :  { %v1215_v2 = vmul.f32 %v3422_v10, %v2934_v25  ;;  %v1237_v29 = vsel %vm323_vm3, %v2934_v25, 0.0  ;;  %v1216_v32 = vsel %vm316_vm2, %v1214_v20, 0.0 }
0x1078   :  { %v1232_v33 = vadd.f32 %v1231_v27, %v1230_v24  ;;  %v1238_v35 = vrot.slane %v1237_v29, 4  ;;  %v1217_v37 = vrot.slane %v1216_v32, 4 }
0x1079   :  { %v1223_v12 = vsel %vm316_vm2, %v1215_v2, 0.0 }
0x107a   :  { %v1233_v38 = vrot.slane %v1232_v33, 2  ;;  %v1239_v40 = vadd.f32 %v1238_v35, %v1237_v29  ;;  %v1224_v41 = vrot.slane %v1223_v12, 4  ;;  %v1218_v50 = vadd.f32 %v1217_v37, %v1216_v32 }
0x107c   :  { %v1234_v43 = vadd.f32 %v1233_v38, %v1232_v33  ;;  %v1240_v44 = vrot.slane %v1239_v40, 2  ;;  %v1225_v47 = vadd.f32 %v1224_v41, %v1223_v12  ;;  %v1219_v53 = vrot.slane %v1218_v50, 2 }
0x107e   :  { %v1235_v48 = vrot.slane %v1234_v43, 1  ;;  %v1241_v49 = vadd.f32 %v1240_v44, %v1239_v40  ;;  %v1226_v54 = vrot.slane %v1225_v47, 2  ;;  %v1220_v57 = vadd.f32 %v1219_v53, %v1218_v50  ;;  %v3483_v53 = vld [vmem:[%s3664_s2 + $0x61] ss:$0 sm:$0xff] }
0x1080   :  { %v1242_v51 = vrot.slane %v1241_v49, 1  ;;  %v1236_v52 = vadd.f32 %v1235_v48, %v1234_v43  ;;  %v1227_v59 = vadd.f32 %v1226_v54, %v1225_v47  ;;  %v1221_v7 = vrot.slane %v1220_v57, 1 }
0x1082   :  { %v1243_v55 = vadd.f32 %v1242_v51, %v1241_v49  ;;  %2935 = vrcp.f32 %v1236_v52  ;;  %v1228_v62 = vrot.slane %v1227_v59, 1  ;;  %v1222_v3 = vadd.f32 %v1221_v7, %v1220_v57 }
0x1084   :  { %2937 = vrcp.f32 %v1243_v55  ;;  %v1229_v5 = vadd.f32 %v1228_v62, %v1227_v59 }
0x108c   :  { %v2936_v63 = vpop.eup %2935 }
0x108d   :  { %v1246_v6 = vmul.f32 %v2936_v63, %v1222_v3 }
0x108e   :  { %v2938_v46 = vpop.eup %2937 }
0x108f   :  { %v1247_v8 = vmul.f32 %v2938_v46, %v1229_v5 }
0x1091   :  { %v1250_v45 = vsel %vm380_vm4, %v1247_v8, %v1246_v6 }
0x1092   :  { %1251 = vrot.lane.b32.xlu1 %v1250_v45, %s3004_s11 }
0x10e1   :  { %v1257_v19 = vpop.permute.xlu0 %1256 }
0x1104   :  { %v1252_v9 = vpop.permute.xlu1 %1251 }
0x1105   :  { %v1254_v13 = vsel %vm52_vm1, %v3383_v28, %v1252_v9  ;;  %v1259_v28 = vmul.f32 %v3226_v23, %v1257_v19 }
0x1106   :  { %2563 = vmatmul.mubr.msk.f32.vlgmr.msra.gmra.mrb[8].mxu1 %vm199_vm5, %v1254_v13 }
0x1107   :  { %2801 = vmatpush3.bf16.msra.mxu1 %v3164_v56  ;;  %2600 = vmatprep.mubr.msk.f32.mxu1 %vm3000_vm0, %v3001_v4 }
0x1108   :  { %2802 = vmatprep.subr.bf16.mxu1 %v2999_v0 }
0x110b   :  { %2804 = vmatpush3.bf16.msra.mxu1 %v3170_v58 }
0x110c   :  { %2805 = vmatprep.subr.bf16.mxu1 %v2999_v0 }
0x110f   :  { %2807 = vmatpush3.bf16.msra.mxu1 %v3180_v61 }
0x1110   :  { %2808 = vmatprep.subr.bf16.mxu1 %v2999_v0 }
0x1113   :  { %2810 = vmatpush3.bf16.msra.mxu1 %v3190_v1 }
0x1114   :  { %2823 = vmatprep.subr.bf16.mxu1 %v2999_v0 }
0x11d9   :  { %v1329_v14 = vpop.f32.mrb[8].mxu1 }
0x11da   :  { %v1330_v16 = vadd.f32 %v1329_v14, %v1259_v28  ;;  %v2564_v20 = vpop.f32.mrb[9].mxu1 }
0x11dc   :  { %v1333_v24 = vadd.f32 %v3232_v26, %v1330_v16 }
0x11de   :  { %v1334_v25 = vmul.f32 %v3237_v30, %v1333_v24 }
0x11e0   :  { %2939 = vtanh.f32 %v1334_v25 }
0x11ea   :  { %v2940_v27 = vpop.eup %2939 }
0x11eb   :  { %v1336_v2 = vmul.f32 %v2940_v27, %v3237_v30 }
0x11ed   :  { %v1337_v29 = vadd.f32 %v3244_v36, %v1336_v2 }
0x11ef   :  { %1340 = vrot.lane.b32.xlu1 %v1337_v29, %s3005_s22  ;;  %v1338_v23 = vmul.f32 %v1337_v29, %v3378_v22 }
0x1261   :  { %v1341_v32 = vpop.permute.xlu1 %1340 }
0x1262   :  { %v1343_v33 = vmul.f32 %v1341_v32, %v1337_v29 }
0x1264   :  { %1345 = vrot.lane.b32.xlu1 %v1343_v33, %s3004_s11 }
0x12d6   :  { %v1346_v35 = vpop.permute.xlu1 %1345 }
0x12d7   :  { %v3452_v37 = vadd.f32 %v1346_v35, %v1338_v23 }
0x12d9   :  { %2941 = vtanh.f32 %v3452_v37 }
0x12e3   :  { %v2942_v26 = vpop.eup %2941 }
0x12e4   :  { %1351 = vrot.lane.b32.xlu1 %v2942_v26, %s3005_s22 }
0x1356   :  { %v1352_v12 = vpop.permute.xlu1 %1351 }
0x1357   :  { %v1354_v30 = vmul.f32 %v1352_v12, %v1337_v29 }
0x1359   :  { %1356 = vrot.lane.b32.xlu1 %v1354_v30, %s3004_s11 }
0x13cb   :  { %v3457_v36 = vpop.permute.xlu1 %1356 }
0x13cc   :  { %v1359_v38 = vsel %vm52_vm1, %v3457_v36, %v3452_v37 }
0x13cd   :  { %2582 = vmatmul.mubr.msk.f32.vlgmr.msra.gmra.mrb[10].mxu0 %vm199_vm5, %v1359_v38 }
0x13ce   :  { %2813 = vmatpush3.bf16.msra.mxu0 %v3068_v11  ;;  %2619 = vmatprep.mubr.msk.f32.mxu0 %vm3000_vm0, %v3001_v4 }
0x13cf   :  { %2814 = vmatprep.subr.bf16.mxu0 %v2999_v0 }
0x13d2   :  { %2816 = vmatpush3.bf16.msra.mxu0 %v3088_v15 }
0x13d3   :  { %2817 = vmatprep.subr.bf16.mxu0 %v2999_v0 }
0x13d6   :  { %2819 = vmatpush3.bf16.msra.mxu0 %v3102_v18 }
0x13d7   :  { %2820 = vmatprep.subr.bf16.mxu0 %v2999_v0 }
0x13da   :  { %2822 = vmatpush3.bf16.msra.mxu0 %v3112_v21 }
0x13db   :  { %2835 = vmatprep.subr.bf16.mxu0 %v2999_v0 }
0x14a0   :  { %v1429_v22 = vpop.f32.mrb[10].mxu0 }
0x14a1   :  { %v1440_v40 = vrot.slane %v1429_v22, %v3128_v31  ;;  %v2583_v41 = vpop.f32.mrb[11].mxu0 }
0x14a3   :  { %v1441_v43 = vcombine.high %v1440_v40, %v1440_v40  ;;  %v1448_v44 = vrot.slane %v1440_v40, %v3128_v31 }
0x14a5   :  { %v1455_v50 = vrot.slane %v1441_v43, %v3128_v31  ;;  %v1459_v47 = vrot.slane %v1448_v44, %v3131_v34 }
0x14a7   :  { %v1463_v48 = vrot.slane %v1455_v50, %v3131_v34  ;;  %v1466_v49 = vadd.f32 %v1459_v47, %v3137_v39 }
0x14a9   :  { %v1467_v51 = vadd.f32 %v1463_v48, %v3141_v42  ;;  %2943 = vtanh.f32 %v1466_v49 }
0x14ab   :  { %2945 = vtanh.f32 %v1467_v51 }
0x14b3   :  { %v2944_v52 = vpop.eup %2943 }
0x14b4   :  { %v1470_v54 = vmul.f32 %v3483_v53, %v2944_v52 }
0x14b5   :  { %v2946_v55 = vpop.eup %2945 }
0x14b6   :  { %v1472_v57 = vsel %vm316_vm2, %v1470_v54, 0.0  ;;  %v1471_v59 = vmul.f32 %v3483_v53, %v2946_v55 }
0x14b7   :  { %1473 = vadd.xlane.f32.xlu1 %v1472_v57 }
0x14b8   :  { %v1475_v60 = vsel %vm316_vm2, %v1471_v59, 0.0 }
0x14b9   :  { %1476 = vadd.xlane.f32.xlu0 %v1475_v60 }
0x1544   :  { %v1474_v7 = vpop.xlane.xlu1 %1473 }
0x1545   :  { %v1478_v62 = vsel %vm323_vm3, %v1474_v7, -inf }
0x1546   :  { %v1479_v63 = vrot.slane %v1478_v62, 4  ;;  %v1477_v3 = vpop.xlane.xlu0 %1476 }
0x1547   :  { %v1485_v5 = vsel %vm323_vm3, %v1477_v3, -inf }
0x1548   :  { %v1480_v46 = vmax.f32 %v1478_v62, %v1479_v63  ;;  %v1486_v6 = vrot.slane %v1485_v5, 4 }
0x154a   :  { %v1481_v8 = vrot.slane %v1480_v46, 2  ;;  %v1487_v45 = vmax.f32 %v1485_v5, %v1486_v6 }
0x154c   :  { %v1482_v9 = vmax.f32 %v1480_v46, %v1481_v8  ;;  %v1488_v13 = vrot.slane %v1487_v45, 2 }
0x154e   :  { %v1483_v19 = vrot.slane %v1482_v9, 1  ;;  %v1489_v28 = vmax.f32 %v1487_v45, %v1488_v13 }
0x1550   :  { %v1484_v14 = vmax.f32 %v1482_v9, %v1483_v19  ;;  %v1490_v16 = vrot.slane %v1489_v28, 1 }
0x1552   :  { %v1492_v20 = vsub.f32 %v1474_v7, %v1484_v14  ;;  %v1491_v24 = vmax.f32 %v1489_v28, %v1490_v16  ;;  %v3502_v14 = vld [vmem:[%s3667_s1] sm:$0x3] }
0x1554   :  { %v1494_v25 = vmul.f32 1.442695, %v1492_v20  ;;  %v1493_v27 = vsub.f32 %v1477_v3, %v1491_v24  ;;  %v3009_v3 = vmov 4   ;;  %v3521_v24 = vld [vmem:[%s3666_s3 + $0x40] ss:$0 sm:$0xff] }
0x1555   :  { %2876 = vset.pattern.permute.xlu1 %v3009_v3 }
0x1556   :  { %2947 = vpow2.f32 %v1494_v25  ;;  %v1496_v2 = vmul.f32 1.442695, %v1493_v27 }
0x1558   :  { %2949 = vpow2.f32 %v1496_v2 }
0x1560   :  { %v2948_v29 = vpop.eup %2947 }
0x1561   :  { %v1498_v32 = vmul.f32 %v3415_v17, %v2948_v29  ;;  %v1514_v33 = vsel %vm323_vm3, %v2948_v29, 0.0 }
0x1562   :  { %v2950_v23 = vpop.eup %2949  ;;  %v1515_v35 = vrot.slane %v1514_v33, 4 }
0x1563   :  { %v1499_v26 = vmul.f32 %v3422_v10, %v2950_v23  ;;  %v1521_v12 = vsel %vm323_vm3, %v2950_v23, 0.0  ;;  %v1500_v30 = vsel %vm316_vm2, %v1498_v32, 0.0  ;;  %v3527_v32 = vld [vmem:[%s3666_s3 + $0x41] ss:$0 sm:$0xff]  ;;  %v3533_v23 = vld [vmem:[%s3666_s3 + $0x42] ss:$0 sm:$0xff] }
0x1564   :  { %v1516_v38 = vadd.f32 %v1515_v35, %v1514_v33  ;;  %v1522_v22 = vrot.slane %v1521_v12, 4  ;;  %v1501_v40 = vrot.slane %v1500_v30, 4 }
0x1565   :  { %v1507_v41 = vsel %vm316_vm2, %v1499_v26, 0.0 }
0x1566   :  { %v1517_v43 = vrot.slane %v1516_v38, 2  ;;  %v1523_v44 = vadd.f32 %v1522_v22, %v1521_v12  ;;  %v1508_v50 = vrot.slane %v1507_v41, 4  ;;  %v1502_v49 = vadd.f32 %v1501_v40, %v1500_v30  ;;  %v3540_v30 = vld [vmem:[%s3666_s3 + $0x43] ss:$0 sm:$0xff] }
0x1568   :  { %v1518_v47 = vadd.f32 %v1517_v43, %v1516_v38  ;;  %v1524_v48 = vrot.slane %v1523_v44, 2  ;;  %v1509_v51 = vadd.f32 %v1508_v50, %v1507_v41  ;;  %v1503_v59 = vrot.slane %v1502_v49, 2 }
0x156a   :  { %v1519_v52 = vrot.slane %v1518_v47, 1  ;;  %v1525_v54 = vadd.f32 %v1524_v48, %v1523_v44  ;;  %v1510_v60 = vrot.slane %v1509_v51, 2  ;;  %v1504_v62 = vadd.f32 %v1503_v59, %v1502_v49 }
0x156c   :  { %v1526_v55 = vrot.slane %v1525_v54, 1  ;;  %v1520_v57 = vadd.f32 %v1519_v52, %v1518_v47  ;;  %v1511_v63 = vadd.f32 %v1510_v60, %v1509_v51  ;;  %v1505_v5 = vrot.slane %v1504_v62, 1 }
0x156e   :  { %v1527_v7 = vadd.f32 %v1526_v55, %v1525_v54  ;;  %2951 = vrcp.f32 %v1520_v57  ;;  %v1512_v46 = vrot.slane %v1511_v63, 1  ;;  %v1506_v8 = vadd.f32 %v1505_v5, %v1504_v62 }
0x1570   :  { %2953 = vrcp.f32 %v1527_v7  ;;  %v1513_v45 = vadd.f32 %v1512_v46, %v1511_v63 }
0x1578   :  { %v2952_v6 = vpop.eup %2951 }
0x1579   :  { %v1530_v13 = vmul.f32 %v2952_v6, %v1506_v8 }
0x157a   :  { %v2954_v9 = vpop.eup %2953 }
0x157b   :  { %v1531_v19 = vmul.f32 %v2954_v9, %v1513_v45 }
0x157d   :  { %v1534_v28 = vsel %vm380_vm4, %v1531_v19, %v1530_v13 }
0x157e   :  { %1535 = vrot.lane.b32.xlu1 %v1534_v28, %s3004_s11 }
0x1582   :  { %1540 = vperm.xlu1 %2876, %v3502_v14  }
0x15f0   :  { %v1536_v16 = vpop.permute.xlu1 %1535 }
0x15f1   :  { %v1538_v20 = vsel %vm52_vm1, %v3457_v36, %v1536_v16 }
0x15f2   :  { %2601 = vmatmul.mubr.msk.f32.vlgmr.msra.gmra.mrb[10].mxu1 %vm199_vm5, %v1538_v20 }
0x15f3   :  { %2825 = vmatpush3.bf16.msra.mxu1 %v3164_v56  ;;  %2638 = vmatprep.mubr.msk.f32.mxu1 %vm3000_vm0, %v3001_v4 }
0x15f4   :  { %2826 = vmatprep.subr.bf16.mxu1 %v2999_v0 }
0x15f7   :  { %2828 = vmatpush3.bf16.msra.mxu1 %v3170_v58 }
0x15f8   :  { %2829 = vmatprep.subr.bf16.mxu1 %v2999_v0 }
0x15fb   :  { %2831 = vmatpush3.bf16.msra.mxu1 %v3180_v61 }
0x15fc   :  { %2832 = vmatprep.subr.bf16.mxu1 %v2999_v0 }
0x15ff   :  { %2834 = vmatpush3.bf16.msra.mxu1 %v3190_v1 }
0x1600   :  { %2847 = vmatprep.subr.bf16.mxu1 %v2999_v0 }
0x1601   :  { %v1541_v36 = vpop.permute.xlu1 %1540 }
0x1602   :  { %v1543_v25 = vmul.f32 %v3521_v24, %v1541_v36 }
0x16c5   :  { %v1613_v27 = vpop.f32.mrb[10].mxu1 }
0x16c6   :  { %v1614_v2 = vadd.f32 %v1613_v27, %v1543_v25  ;;  %v2602_v29 = vpop.f32.mrb[11].mxu1 }
0x16c8   :  { %v1617_v33 = vadd.f32 %v3527_v32, %v1614_v2 }
0x16ca   :  { %v1618_v35 = vmul.f32 %v3533_v23, %v1617_v33 }
0x16cc   :  { %2955 = vtanh.f32 %v1618_v35 }
0x16d6   :  { %v2956_v26 = vpop.eup %2955 }
0x16d7   :  { %v1620_v12 = vmul.f32 %v3533_v23, %v2956_v26 }
0x16d9   :  { %v1621_v38 = vadd.f32 %v3540_v30, %v1620_v12 }
0x16db   :  { %1624 = vrot.lane.b32.xlu1 %v1621_v38, %s3005_s22  ;;  %v1622_v41 = vmul.f32 %v1621_v38, %v3452_v37 }
0x174d   :  { %v1625_v22 = vpop.permute.xlu1 %1624 }
0x174e   :  { %v1627_v40 = vmul.f32 %v1625_v22, %v1621_v38 }
0x1750   :  { %1629 = vrot.lane.b32.xlu0 %v1627_v40, %s3004_s11 }
0x17c2   :  { %v1630_v43 = vpop.permute.xlu0 %1629 }
0x17c3   :  { %v3546_v44 = vadd.f32 %v1630_v43, %v1622_v41 }
0x17c5   :  { %2957 = vtanh.f32 %v3546_v44 }
0x17cf   :  { %v2958_v50 = vpop.eup %2957 }
0x17d0   :  { %1635 = vrot.lane.b32.xlu1 %v2958_v50, %s3005_s22 }
0x1842   :  { %v1636_v47 = vpop.permute.xlu1 %1635 }
0x1843   :  { %v1638_v48 = vmul.f32 %v1636_v47, %v1621_v38 }
0x1845   :  { %1640 = vrot.lane.b32.xlu1 %v1638_v48, %s3004_s11 }
0x18b7   :  { %v3551_v49 = vpop.permute.xlu1 %1640 }
0x18b8   :  { %v1643_v51 = vsel %vm52_vm1, %v3551_v49, %v3546_v44 }
0x18b9   :  { %2620 = vmatmul.mubr.msk.f32.vlgmr.msra.gmra.mrb[12].mxu0 %vm199_vm5, %v1643_v51 }
0x18ba   :  { %2837 = vmatpush3.bf16.msra.mxu0 %v3068_v11  ;;  %2657 = vmatprep.mubr.msk.f32.mxu0 %vm3000_vm0, %v3001_v4 }
0x18bb   :  { %2838 = vmatprep.subr.bf16.mxu0 %v2999_v0 }
0x18be   :  { %2840 = vmatpush3.bf16.msra.mxu0 %v3088_v15 }
0x18bf   :  { %2841 = vmatprep.subr.bf16.mxu0 %v2999_v0 }
0x18c2   :  { %2843 = vmatpush3.bf16.msra.mxu0 %v3102_v18 }
0x18c3   :  { %2844 = vmatprep.subr.bf16.mxu0 %v2999_v0 }
0x18c6   :  { %2846 = vmatpush3.bf16.msra.mxu0 %v3112_v21 }
0x198c   :  { %v1713_v37 = vpop.f32.mrb[12].mxu0 }
0x198d   :  { %v1724_v52 = vrot.slane %v1713_v37, %v3128_v31  ;;  %v2621_v54 = vpop.f32.mrb[13].mxu0 }
0x198f   :  { %v1725_v11 = vcombine.high %v1724_v52, %v1724_v52  ;;  %v1732_v55 = vrot.slane %v1724_v52, %v3128_v31 }
0x1991   :  { %v1739_v57 = vrot.slane %v1725_v11, %v3128_v31  ;;  %v1743_v59 = vrot.slane %v1732_v55, %v3131_v34 }
0x1993   :  { %v1747_v15 = vrot.slane %v1739_v57, %v3131_v34  ;;  %v1750_v60 = vadd.f32 %v1743_v59, %v3137_v39 }
0x1995   :  { %v1751_v18 = vadd.f32 %v1747_v15, %v3141_v42  ;;  %2959 = vtanh.f32 %v1750_v60 }
0x1997   :  { %2961 = vtanh.f32 %v1751_v18 }
0x199f   :  { %v2960_v21 = vpop.eup %2959 }
0x19a0   :  { %v1754_v7 = vmul.f32 %v3483_v53, %v2960_v21 }
0x19a1   :  { %v2962_v62 = vpop.eup %2961 }
0x19a2   :  { %v1756_v63 = vsel %vm316_vm2, %v1754_v7, 0.0  ;;  %v1755_v3 = vmul.f32 %v3483_v53, %v2962_v62 }
0x19a3   :  { %1757 = vadd.xlane.f32.xlu1 %v1756_v63 }
0x19a4   :  { %v1759_v5 = vsel %vm316_vm2, %v1755_v3, 0.0 }
0x19a5   :  { %1760 = vadd.xlane.f32.xlu0 %v1759_v5 }
0x1a30   :  { %v1758_v46 = vpop.xlane.xlu1 %1757 }
0x1a31   :  { %v1762_v6 = vsel %vm323_vm3, %v1758_v46, -inf }
0x1a32   :  { %v1763_v8 = vrot.slane %v1762_v6, 4  ;;  %v1761_v45 = vpop.xlane.xlu0 %1760 }
0x1a33   :  { %v1769_v9 = vsel %vm323_vm3, %v1761_v45, -inf }
0x1a34   :  { %v1764_v13 = vmax.f32 %v1762_v6, %v1763_v8  ;;  %v1770_v19 = vrot.slane %v1769_v9, 4 }
0x1a36   :  { %v1765_v28 = vrot.slane %v1764_v13, 2  ;;  %v1771_v16 = vmax.f32 %v1769_v9, %v1770_v19  ;;  %v3010_v9 = vmov 5  }
0x1a37   :  { %2877 = vset.pattern.permute.xlu0 %v3010_v9 }
0x1a38   :  { %v1766_v20 = vmax.f32 %v1764_v13, %v1765_v28  ;;  %v1772_v36 = vrot.slane %v1771_v16, 2  ;;  %1824 = vperm.xlu0 %2877, %v3502_v14  }
0x1a3a   :  { %v1767_v25 = vrot.slane %v1766_v20, 1  ;;  %v1773_v27 = vmax.f32 %v1771_v16, %v1772_v36 }
0x1a3c   :  { %v1768_v2 = vmax.f32 %v1766_v20, %v1767_v25  ;;  %v1774_v29 = vrot.slane %v1773_v27, 1 }
0x1a3e   :  { %v1776_v33 = vsub.f32 %v1758_v46, %v1768_v2  ;;  %v1775_v35 = vmax.f32 %v1773_v27, %v1774_v29 }
0x1a40   :  { %v1778_v26 = vmul.f32 1.442695, %v1776_v33  ;;  %v1777_v12 = vsub.f32 %v1761_v45, %v1775_v35 }
0x1a42   :  { %2963 = vpow2.f32 %v1778_v26  ;;  %v1780_v38 = vmul.f32 1.442695, %v1777_v12 }
0x1a44   :  { %2965 = vpow2.f32 %v1780_v38 }
0x1a4c   :  { %v2964_v22 = vpop.eup %2963 }
0x1a4d   :  { %v1782_v40 = vmul.f32 %v3415_v17, %v2964_v22  ;;  %v1798_v41 = vsel %vm323_vm3, %v2964_v22, 0.0 }
0x1a4e   :  { %v2966_v43 = vpop.eup %2965  ;;  %v1799_v50 = vrot.slane %v1798_v41, 4 }
0x1a4f   :  { %v1783_v47 = vmul.f32 %v3422_v10, %v2966_v43  ;;  %v1805_v48 = vsel %vm323_vm3, %v2966_v43, 0.0  ;;  %v1784_v51 = vsel %vm316_vm2, %v1782_v40, 0.0 }
0x1a50   :  { %v1800_v37 = vadd.f32 %v1799_v50, %v1798_v41  ;;  %v1806_v52 = vrot.slane %v1805_v48, 4  ;;  %v1785_v54 = vrot.slane %v1784_v51, 4 }
0x1a51   :  { %v1791_v11 = vsel %vm316_vm2, %v1783_v47, 0.0 }
0x1a52   :  { %v1801_v55 = vrot.slane %v1800_v37, 2  ;;  %v1807_v57 = vadd.f32 %v1806_v52, %v1805_v48  ;;  %v1792_v59 = vrot.slane %v1791_v11, 4  ;;  %v1786_v18 = vadd.f32 %v1785_v54, %v1784_v51 }
0x1a54   :  { %v1802_v15 = vadd.f32 %v1801_v55, %v1800_v37  ;;  %v1808_v60 = vrot.slane %v1807_v57, 2  ;;  %v1793_v21 = vadd.f32 %v1792_v59, %v1791_v11  ;;  %v1787_v5 = vrot.slane %v1786_v18, 2 }
0x1a56   :  { %v1803_v7 = vrot.slane %v1802_v15, 1  ;;  %v1809_v62 = vadd.f32 %v1808_v60, %v1807_v57  ;;  %v1794_v46 = vrot.slane %v1793_v21, 2  ;;  %v1788_v8 = vadd.f32 %v1787_v5, %v1786_v18 }
0x1a58   :  { %v1810_v63 = vrot.slane %v1809_v62, 1  ;;  %v1804_v3 = vadd.f32 %v1803_v7, %v1802_v15  ;;  %v1795_v45 = vadd.f32 %v1794_v46, %v1793_v21  ;;  %v1789_v13 = vrot.slane %v1788_v8, 1 }
0x1a5a   :  { %v1811_v6 = vadd.f32 %v1810_v63, %v1809_v62  ;;  %2967 = vrcp.f32 %v1804_v3  ;;  %v1796_v19 = vrot.slane %v1795_v45, 1  ;;  %v1790_v16 = vadd.f32 %v1789_v13, %v1788_v8 }
0x1a5c   :  { %2969 = vrcp.f32 %v1811_v6  ;;  %v1797_v20 = vadd.f32 %v1796_v19, %v1795_v45 }
0x1a64   :  { %v2968_v28 = vpop.eup %2967 }
0x1a65   :  { %v1814_v25 = vmul.f32 %v2968_v28, %v1790_v16 }
0x1a66   :  { %v2970_v36 = vpop.eup %2969 }
0x1a67   :  { %v1815_v27 = vmul.f32 %v2970_v36, %v1797_v20 }
0x1a69   :  { %v1818_v2 = vsel %vm380_vm4, %v1815_v27, %v1814_v25 }
0x1a6a   :  { %1819 = vrot.lane.b32.xlu1 %v1818_v2, %s3004_s11 }
0x1adc   :  { %v1820_v29 = vpop.permute.xlu1 %1819 }
0x1add   :  { %v1822_v33 = vsel %vm52_vm1, %v3551_v49, %v1820_v29  ;;  %v1825_v49 = vpop.permute.xlu0 %1824 }
0x1ade   :  { %2639 = vmatmul.mubr.msk.f32.vlgmr.msra.gmra.mrb[12].mxu1 %vm199_vm5, %v1822_v33  ;;  %v1827_v35 = vmul.f32 %v3521_v24, %v1825_v49 }
0x1adf   :  { %2849 = vmatpush3.bf16.msra.mxu1 %v3164_v56  ;;  %2676 = vmatprep.mubr.msk.f32.mxu1 %vm3000_vm0, %v3001_v4 }
0x1ae0   :  { %2850 = vmatprep.subr.bf16.mxu1 %v2999_v0 }
0x1ae3   :  { %2852 = vmatpush3.bf16.msra.mxu1 %v3170_v58 }
0x1ae4   :  { %2853 = vmatprep.subr.bf16.mxu1 %v2999_v0 }
0x1ae7   :  { %2855 = vmatpush3.bf16.msra.mxu1 %v3180_v61 }
0x1ae8   :  { %2856 = vmatprep.subr.bf16.mxu1 %v2999_v0 }
0x1aeb   :  { %2858 = vmatpush3.bf16.msra.mxu1 %v3190_v1 }
0x1bb1   :  { %v1897_v26 = vpop.f32.mrb[12].mxu1 }
0x1bb2   :  { %v1898_v56 = vadd.f32 %v1897_v26, %v1827_v35  ;;  %v2640_v12 = vpop.f32.mrb[13].mxu1 }
0x1bb4   :  { %v1901_v4 = vadd.f32 %v3527_v32, %v1898_v56 }
0x1bb6   :  { %v1902_v38 = vmul.f32 %v3533_v23, %v1901_v4 }
0x1bb8   :  { %2971 = vtanh.f32 %v1902_v38 }
0x1bc2   :  { %v2972_v58 = vpop.eup %2971 }
0x1bc3   :  { %v1904_v22 = vmul.f32 %v3533_v23, %v2972_v58 }
0x1bc5   :  { %v1905_v61 = vadd.f32 %v3540_v30, %v1904_v22 }
0x1bc7   :  { %1908 = vrot.lane.b32.xlu1 %v1905_v61, %s3005_s22  ;;  %v1906_v40 = vmul.f32 %v1905_v61, %v3546_v44 }
0x1c39   :  { %v1909_v0 = vpop.permute.xlu1 %1908 }
0x1c3a   :  { %v1911_v1 = vmul.f32 %v1909_v0, %v1905_v61 }
0x1c3c   :  { %1913 = vrot.lane.b32.xlu1 %v1911_v1, %s3004_s11 }
0x1cae   :  { %v1914_v41 = vpop.permute.xlu1 %1913 }
0x1caf   :  { %v3608_v43 = vadd.f32 %v1914_v41, %v1906_v40 }
0x1cb1   :  { %2973 = vtanh.f32 %v3608_v43 }
0x1cbb   :  { %v2974_v50 = vpop.eup %2973 }
0x1cbc   :  { %1919 = vrot.lane.b32.xlu1 %v2974_v50, %s3005_s22 }
0x1d2e   :  { %v1920_v47 = vpop.permute.xlu1 %1919 }
0x1d2f   :  { %v1922_v48 = vmul.f32 %v1920_v47, %v1905_v61 }
0x1d31   :  { %1924 = vrot.lane.b32.xlu1 %v1922_v48, %s3004_s11 }
0x1da3   :  { %v3613_v51 = vpop.permute.xlu1 %1924 }
0x1da4   :  { %v1927_v37 = vsel %vm52_vm1, %v3613_v51, %v3608_v43 }
0x1da5   :  { %2658 = vmatmul.mubr.msk.f32.vlgmr.msra.gmra.mrb[14].mxu0 %vm199_vm5, %v1927_v37 }
0x1e78   :  { %v1997_v44 = vpop.f32.mrb[14].mxu0 }
0x1e79   :  { %v2008_v52 = vrot.slane %v1997_v44, %v3128_v31  ;;  %v2659_v54 = vpop.f32.mrb[15].mxu0 }
0x1e7b   :  { %v2009_v11 = vcombine.high %v2008_v52, %v2008_v52  ;;  %v2016_v55 = vrot.slane %v2008_v52, %v3128_v31 }
0x1e7d   :  { %v2023_v57 = vrot.slane %v2009_v11, %v3128_v31  ;;  %v2027_v59 = vrot.slane %v2016_v55, %v3131_v34 }
0x1e7f   :  { %v2031_v15 = vrot.slane %v2023_v57, %v3131_v34  ;;  %v2034_v60 = vadd.f32 %v2027_v59, %v3137_v39 }
0x1e81   :  { %v2035_v18 = vadd.f32 %v2031_v15, %v3141_v42  ;;  %2975 = vtanh.f32 %v2034_v60  ;;  %v3011_v15 = vmov 6  }
0x1e82   :  { %2878 = vset.pattern.permute.xlu0 %v3011_v15 }
0x1e83   :  { %2977 = vtanh.f32 %v2035_v18 }
0x1e8b   :  { %v2976_v21 = vpop.eup %2975 }
0x1e8c   :  { %v2038_v7 = vmul.f32 %v3483_v53, %v2976_v21 }
0x1e8d   :  { %v2978_v62 = vpop.eup %2977 }
0x1e8e   :  { %v2040_v63 = vsel %vm316_vm2, %v2038_v7, 0.0  ;;  %v2039_v3 = vmul.f32 %v3483_v53, %v2978_v62 }
0x1e8f   :  { %2041 = vadd.xlane.f32.xlu1 %v2040_v63 }
0x1e90   :  { %v2043_v31 = vsel %vm316_vm2, %v2039_v3, 0.0 }
0x1e91   :  { %2044 = vadd.xlane.f32.xlu0 %v2043_v31 }
0x1ea7   :  { %2108 = vperm.xlu0 %2878, %v3502_v14  }
0x1f1c   :  { %v2042_v5 = vpop.xlane.xlu1 %2041 }
0x1f1d   :  { %v2046_v34 = vsel %vm323_vm3, %v2042_v5, -inf }
0x1f1e   :  { %v2047_v39 = vrot.slane %v2046_v34, 4  ;;  %v2045_v46 = vpop.xlane.xlu0 %2044 }
0x1f1f   :  { %v2053_v42 = vsel %vm323_vm3, %v2045_v46, -inf }
0x1f20   :  { %v2048_v6 = vmax.f32 %v2046_v34, %v2047_v39  ;;  %v2054_v8 = vrot.slane %v2053_v42, 4 }
0x1f22   :  { %v2049_v45 = vrot.slane %v2048_v6, 2  ;;  %v2055_v9 = vmax.f32 %v2053_v42, %v2054_v8 }
0x1f24   :  { %v2050_v13 = vmax.f32 %v2048_v6, %v2049_v45  ;;  %v2056_v19 = vrot.slane %v2055_v9, 2 }
0x1f26   :  { %v2051_v28 = vrot.slane %v2050_v13, 1  ;;  %v2057_v16 = vmax.f32 %v2055_v9, %v2056_v19 }
0x1f28   :  { %v2052_v53 = vmax.f32 %v2050_v13, %v2051_v28  ;;  %v2058_v20 = vrot.slane %v2057_v16, 1 }
0x1f2a   :  { %v2060_v36 = vsub.f32 %v2042_v5, %v2052_v53  ;;  %v2059_v25 = vmax.f32 %v2057_v16, %v2058_v20 }
0x1f2c   :  { %v2062_v27 = vmul.f32 1.442695, %v2060_v36  ;;  %v2061_v2 = vsub.f32 %v2045_v46, %v2059_v25  ;;  %v2109_v46 = vpop.permute.xlu0 %2108 }
0x1f2d   :  { %v2111_v14 = vmul.f32 %v3521_v24, %v2109_v46 }
0x1f2e   :  { %2979 = vpow2.f32 %v2062_v27  ;;  %v2064_v29 = vmul.f32 1.442695, %v2061_v2 }
0x1f30   :  { %2981 = vpow2.f32 %v2064_v29  ;;  %v2254_v29 = vld [vmem:[%s3666_s3 + $0x45] ss:$0 sm:$0xff] }
0x1f38   :  { %v2980_v33 = vpop.eup %2979 }
0x1f39   :  { %v2066_v49 = vmul.f32 %v3415_v17, %v2980_v33  ;;  %v2082_v35 = vsel %vm323_vm3, %v2980_v33, 0.0 }
0x1f3a   :  { %v2982_v26 = vpop.eup %2981  ;;  %v2083_v56 = vrot.slane %v2082_v35, 4 }
0x1f3b   :  { %v2067_v12 = vmul.f32 %v3422_v10, %v2982_v26  ;;  %v2089_v4 = vsel %vm323_vm3, %v2982_v26, 0.0  ;;  %v2068_v38 = vsel %vm316_vm2, %v2066_v49, 0.0 }
0x1f3c   :  { %v2084_v58 = vadd.f32 %v2083_v56, %v2082_v35  ;;  %v2090_v22 = vrot.slane %v2089_v4, 4  ;;  %v2069_v61 = vrot.slane %v2068_v38, 4 }
0x1f3d   :  { %v2075_v0 = vsel %vm316_vm2, %v2067_v12, 0.0 }
0x1f3e   :  { %v2085_v1 = vrot.slane %v2084_v58, 2  ;;  %v2091_v40 = vadd.f32 %v2090_v22, %v2089_v4  ;;  %v2076_v41 = vrot.slane %v2075_v0, 4  ;;  %v2070_v47 = vadd.f32 %v2069_v61, %v2068_v38 }
0x1f40   :  { %v2086_v50 = vadd.f32 %v2085_v1, %v2084_v58  ;;  %v2092_v17 = vrot.slane %v2091_v40, 2  ;;  %v2077_v48 = vadd.f32 %v2076_v41, %v2075_v0  ;;  %v2071_v54 = vrot.slane %v2070_v47, 2 }
0x1f42   :  { %v2087_v37 = vrot.slane %v2086_v50, 1  ;;  %v2093_v44 = vadd.f32 %v2092_v17, %v2091_v40  ;;  %v2078_v11 = vrot.slane %v2077_v48, 2  ;;  %v2072_v57 = vadd.f32 %v2071_v54, %v2070_v47 }
0x1f44   :  { %v2094_v52 = vrot.slane %v2093_v44, 1  ;;  %v2088_v10 = vadd.f32 %v2087_v37, %v2086_v50  ;;  %v2079_v59 = vadd.f32 %v2078_v11, %v2077_v48  ;;  %v2073_v60 = vrot.slane %v2072_v57, 1 }
0x1f46   :  { %v2095_v55 = vadd.f32 %v2094_v52, %v2093_v44  ;;  %2983 = vrcp.f32 %v2088_v10  ;;  %v2080_v18 = vrot.slane %v2079_v59, 1  ;;  %v2074_v7 = vadd.f32 %v2073_v60, %v2072_v57 }
0x1f48   :  { %2985 = vrcp.f32 %v2095_v55  ;;  %v2081_v62 = vadd.f32 %v2080_v18, %v2079_v59 }
0x1f50   :  { %v2984_v21 = vpop.eup %2983 }
0x1f51   :  { %v2098_v3 = vmul.f32 %v2984_v21, %v2074_v7 }
0x1f52   :  { %v2986_v63 = vpop.eup %2985 }
0x1f53   :  { %v2099_v31 = vmul.f32 %v2986_v63, %v2081_v62 }
0x1f55   :  { %v2102_v5 = vsel %vm380_vm4, %v2099_v31, %v2098_v3 }
0x1f56   :  { %2103 = vrot.lane.b32.xlu1 %v2102_v5, %s3004_s11 }
0x1fc8   :  { %v2104_v34 = vpop.permute.xlu1 %2103 }
0x1fc9   :  { %v2106_v39 = vsel %vm52_vm1, %v3613_v51, %v2104_v34 }
0x1fca   :  { %2677 = vmatmul.mubr.msk.f32.vlgmr.msra.gmra.mrb[14].mxu1 %vm199_vm5, %v2106_v39 }
0x209d   :  { %v2181_v42 = vpop.f32.mrb[14].mxu1 }
0x209e   :  { %v2182_v6 = vadd.f32 %v2181_v42, %v2111_v14  ;;  %v2678_v8 = vpop.f32.mrb[15].mxu1 }
0x20a0   :  { %v2185_v45 = vadd.f32 %v3527_v32, %v2182_v6 }
0x20a2   :  { %v2186_v9 = vmul.f32 %v3533_v23, %v2185_v45 }
0x20a4   :  { %2987 = vtanh.f32 %v2186_v9 }
0x20ae   :  { %v2988_v13 = vpop.eup %2987 }
0x20af   :  { %v2188_v19 = vmul.f32 %v3533_v23, %v2988_v13  ;;  %v2253_v23 = vld [vmem:[%s3666_s3 + $0x44] ss:$0 sm:$0xff] }
0x20b1   :  { %v2189_v28 = vadd.f32 %v3540_v30, %v2188_v19 }
0x20b3   :  { %2192 = vrot.lane.b32.xlu1 %v2189_v28, %s3005_s22  ;;  %v2190_v24 = vmul.f32 %v2189_v28, %v3608_v43 }
0x2125   :  { %v2193_v51 = vpop.permute.xlu1 %2192 }
0x2126   :  { %v2195_v16 = vmul.f32 %v2193_v51, %v2189_v28 }
0x2128   :  { %2197 = vrot.lane.b32.xlu1 %v2195_v16, %s3004_s11 }
0x219a   :  { %v2198_v53 = vpop.permute.xlu1 %2197 }
0x219b   :  { %v2200_v20 = vadd.f32 %v2198_v53, %v2190_v24 }
0x219d   :  { %2989 = vtanh.f32 %v2200_v20 }
0x21a7   :  { %v2990_v32 = vpop.eup %2989 }
0x21a8   :  { %2203 = vrot.lane.b32.xlu1 %v2990_v32, %s3005_s22 }
0x221a   :  { %v2204_v36 = vpop.permute.xlu1 %2203 }
0x221b   :  { %v2206_v25 = vmul.f32 %v2204_v36, %v2189_v28 }
0x221d   :  { %2208 = vrot.lane.b32.xlu1 %v2206_v25, %s3004_s11 }
0x228f   :  { %v2209_v30 = vpop.permute.xlu1 %2208 }
0x2290   :  { %v2211_v27 = vsel %vm52_vm1, %v2209_v30, %v2104_v34 }
0x2291   :  { %v2216_v2 = vmul.f32 %v2253_v23, %v2211_v27 }
0x2293   :  { %v2218_v43 = vsel %vm2217_vm6, %v2216_v2, 0.0 }
0x2294   :  { %2219 = vadd.xlane.f32.xlu1 %v2218_v43 }
0x2321   :  { %v2220_v33 = vpop.xlane.xlu1 %2219 }
0x2322   :  { %v2225_v49 = vadd.f32 %v2254_v29, %v2220_v33 }
0x2324   :  { %2227 = vst.msk [vmem:[%s3668_s4] sm:$0x3] %vm2226_vm7, %v2225_v49 }

</bundles_post_ra>
